<compile_context>
chip_gen: v7x
topology: tpu7x:2x2x1
jax: 0.10.0
libtpu: 0.0.40
codegen_flags: <defaults>
</compile_context>

<pallas_src>
import jax
import jax.numpy as jnp
from jax.experimental import pallas as pl
from jax.experimental.pallas import tpu as pltpu


# ---------------------------------------------------------------------------
# Pallas kernel: whole batch in one invocation.
# ---------------------------------------------------------------------------
def _net3_kernel(xcol_ref, wcf_ref, bc_ref, w1_ref, b1_ref, w2_ref, b2_ref,
                 out_ref):
    B, Lc, _ = xcol_ref.shape          # Lc = L - 2 (after conv, k=3)
    Lp = Lc - 2                        # after maxpool1d(k=3, stride=1)

    for b in range(B):                 # static unroll over the (small) batch
        # --- Conv1d as one im2col matmul + bias, then ReLU ------------------
        xcol = xcol_ref[b]                                     # (Lc, 3*Cin)
        conv = jnp.dot(xcol, wcf_ref[...],
                       preferred_element_type=jnp.float32) + bc_ref[...]
        conv = jnp.maximum(conv, 0.0)                          # (Lc, Cout)

        # --- MaxPool1d(kernel_size=3, stride=1) along time ------------------
        pooled = jnp.maximum(jnp.maximum(conv[0:Lp, :], conv[1:Lp + 1, :]),
                             conv[2:Lp + 2, :])                # (Lp, Cout)

        # --- Linear1 (contracts the time axis), transposed domain -----------
        # h1[j, c] = sum_t W1[j, t] * pooled[t, c] + b1[j]
        h1 = jnp.dot(w1_ref[...], pooled,
                     preferred_element_type=jnp.float32) + b1_ref[...]
        h1 = jnp.maximum(h1, 0.0)                              # (64, Cout)

        # --- Linear2, transposed domain --------------------------------------
        # h2[o, c] = sum_j W2[o, j] * h1[j, c] + b2[o]
        h2 = jnp.dot(w2_ref[...], h1,
                     preferred_element_type=jnp.float32) + b2_ref[...]
        h2 = jnp.maximum(h2, 0.0)                              # (Osz, Cout)

        out_ref[b] = h2.astype(out_ref.dtype)


# ---------------------------------------------------------------------------
# Wrapper (takes PyTorch-layout parameters).
# ---------------------------------------------------------------------------
def net3_forward(x, params):
    Wc, bc, W1, b1, W2, b2 = params     # PyTorch layouts:
    # Wc: (Cout, Cin, 3), bc: (Cout,), W1: (64, 324), b1: (64,),
    # W2: (Osz, 64),      b2: (Osz,)
    B, L, Cin = x.shape
    Cout, _, K = Wc.shape
    H1, F1 = W1.shape
    Osz = W2.shape[0]
    Lc = L - (K - 1)                    # after conv
    Lp = Lc - 2                         # after pool
    assert K == 3 and F1 == Lp, "Linear(324, 64) requires L - 4 == 324"

    # im2col slab (layout plumbing, done wrapper-side in XLA): (B, Lc, 3*Cin)
    xcol = jnp.concatenate([x[:, k:k + Lc, :] for k in range(K)], axis=2)
    # Conv weight (Cout, Cin, K) -> (K*Cin, Cout), matching xcol's column order.
    wc_flat = jnp.transpose(Wc, (2, 1, 0)).reshape(K * Cin, Cout)
    bc2 = bc.reshape(1, Cout)           # broadcast along time (sublanes)
    b1c = b1.reshape(H1, 1)             # broadcast along channels (lanes)
    b2c = b2.reshape(Osz, 1)

    vmem = pl.BlockSpec(memory_space=pltpu.MemorySpace.VMEM)
    out = pl.pallas_call(
        _net3_kernel,
        out_shape=jax.ShapeDtypeStruct((B, Osz, Cout), jnp.float32),
        in_specs=[vmem] * 7,
        out_specs=vmem,
    )(xcol, wc_flat, bc2, W1, b1c, W2, b2c)

    # out[b, o, c]  ->  PyTorch flatten(start_dim=1) of (B, Cout, Osz):
    # final[b, c*Osz + o]
    return jnp.transpose(out, (0, 2, 1)).reshape(B, Cout * Osz)


# ---------------------------------------------------------------------------
# Pure-JAX reference mirroring the PyTorch forward.
# ---------------------------------------------------------------------------
def net3_reference(x, params):
    Wc, bc, W1, b1, W2, b2 = params
    B, L, Cin = x.shape
    Cout, _, K = Wc.shape
    Lc, Lp = L - 2, L - 4

    x_ncl = jnp.swapaxes(x, 1, 2)                          # (B, Cin, L)
    conv = jnp.zeros((B, Cout, Lc), jnp.float32)
    for k in range(K):
        conv = conv + jnp.einsum("bcl,oc->bol",
                                 x_ncl[:, :, k:k + Lc], Wc[:, :, k])
    conv = jax.nn.relu(conv + bc[None, :, None])           # (B, Cout, Lc)
    pooled = jnp.maximum(jnp.maximum(conv[..., 0:Lp], conv[..., 1:Lp + 1]),
                         conv[..., 2:Lp + 2])              # (B, Cout, Lp)
    h1 = jax.nn.relu(jnp.einsum("bct,jt->bcj", pooled, W1) + b1)   # (B, Cout, 64)
    h2 = jax.nn.relu(jnp.einsum("bcj,oj->bco", h1, W2) + b2)       # (B, Cout, Osz)
    return h2.reshape(B, -1)


# ---------------------------------------------------------------------------
if __name__ == "__main__":
    # Shapes consistent with the module: Linear(324, 64) forces L - 4 == 324.
    B = 2
    in_channels, out_channels = 4, 8
    output_size = 10
    H1 = 64
    L = 328

    key = jax.random.PRNGKey(0)
    ks = jax.random.split(key, 7)
    s = 0.1
    Wc = s * jax.random.normal(ks[0], (out_channels, in_channels, 3), jnp.float32)
    bc = s * jax.random.normal(ks[1], (out_channels,), jnp.float32)
    W1 = s * jax.random.normal(ks[2], (H1, 324), jnp.float32)
    b1 = s * jax.random.normal(ks[3], (H1,), jnp.float32)
    W2 = s * jax.random.normal(ks[4], (output_size, H1), jnp.float32)
    b2 = s * jax.random.normal(ks[5], (output_size,), jnp.float32)
    params = (Wc, bc, W1, b1, W2, b2)

    x = jax.random.normal(ks[6], (B, L, in_channels), jnp.float32)

    y = jax.block_until_ready(net3_forward(x, params))
    y_ref = net3_reference(x, params)

    assert y.shape == (B, out_channels * output_size), y.shape
    assert jnp.allclose(y, y_ref, rtol=2e-2, atol=2e-2), (
        float(jnp.max(jnp.abs(y - y_ref))))
    print("KERNEL_OK")
</pallas_src>

<mosaic_0001>
module attributes {stable_mosaic.version = 11 : i64} {
  func.func @_net3_kernel(%arg0: memref<2x326x12xf32, #tpu.memory_space<vmem>>, %arg1: memref<12x8xf32, #tpu.memory_space<vmem>>, %arg2: memref<1x8xf32, #tpu.memory_space<vmem>>, %arg3: memref<64x324xf32, #tpu.memory_space<vmem>>, %arg4: memref<64x1xf32, #tpu.memory_space<vmem>>, %arg5: memref<10x64xf32, #tpu.memory_space<vmem>>, %arg6: memref<10x1xf32, #tpu.memory_space<vmem>>, %arg7: memref<2x10x8xf32, #tpu.memory_space<vmem>>) attributes {dimension_semantics = [], scalar_prefetch = 0 : i64, scratch_operands = 0 : i64, tpu.core_type = #tpu.core_type<tc>} {
    %c0 = arith.constant 0 : index
    %c0_0 = arith.constant 0 : index
    %c0_1 = arith.constant 0 : index
    %0 = vector.load %arg0[%c0, %c0_0, %c0_1] : memref<2x326x12xf32, #tpu.memory_space<vmem>>, vector<1x326x12xf32>
    %1 = vector.shape_cast %0 : vector<1x326x12xf32> to vector<326x12xf32>
    %c0_2 = arith.constant 0 : index
    %c0_3 = arith.constant 0 : index
    %2 = vector.load %arg1[%c0_2, %c0_3] : memref<12x8xf32, #tpu.memory_space<vmem>>, vector<12x8xf32>
    %cst = arith.constant dense<0.000000e+00> : vector<326x8xf32>
    %3 = tpu.matmul %1, %2, %cst {dimension_numbers = #tpu.dot_dimension_numbers<[1], [0], [0], [1], [0, 0, 1, 1], [], []>} : vector<326x12xf32>, vector<12x8xf32>, vector<326x8xf32> -> vector<326x8xf32>
    %c0_4 = arith.constant 0 : index
    %c0_5 = arith.constant 0 : index
    %4 = vector.load %arg2[%c0_4, %c0_5] : memref<1x8xf32, #tpu.memory_space<vmem>>, vector<1x8xf32>
    %5 = vector.broadcast %4 : vector<1x8xf32> to vector<326x8xf32>
    %6 = arith.addf %3, %5 : vector<326x8xf32>
    %cst_6 = arith.constant 0.000000e+00 : f32
    %7 = vector.broadcast %cst_6 : f32 to vector<326x8xf32>
    %8 = arith.maximumf %6, %7 : vector<326x8xf32>
    %9 = vector.extract_strided_slice %8 {offsets = [0, 0], sizes = [324, 8], strides = [1, 1]} : vector<326x8xf32> to vector<324x8xf32>
    %10 = vector.extract_strided_slice %8 {offsets = [1, 0], sizes = [324, 8], strides = [1, 1]} : vector<326x8xf32> to vector<324x8xf32>
    %11 = arith.maximumf %9, %10 : vector<324x8xf32>
    %12 = vector.extract_strided_slice %8 {offsets = [2, 0], sizes = [324, 8], strides = [1, 1]} : vector<326x8xf32> to vector<324x8xf32>
    %13 = arith.maximumf %11, %12 : vector<324x8xf32>
    %c0_7 = arith.constant 0 : index
    %c0_8 = arith.constant 0 : index
    %14 = vector.load %arg3[%c0_7, %c0_8] : memref<64x324xf32, #tpu.memory_space<vmem>>, vector<64x324xf32>
    %cst_9 = arith.constant dense<0.000000e+00> : vector<64x8xf32>
    %15 = tpu.matmul %14, %13, %cst_9 {dimension_numbers = #tpu.dot_dimension_numbers<[1], [0], [0], [1], [0, 0, 1, 1], [], []>} : vector<64x324xf32>, vector<324x8xf32>, vector<64x8xf32> -> vector<64x8xf32>
    %c0_10 = arith.constant 0 : index
    %c0_11 = arith.constant 0 : index
    %16 = vector.load %arg4[%c0_10, %c0_11] : memref<64x1xf32, #tpu.memory_space<vmem>>, vector<64x1xf32>
    %17 = vector.broadcast %16 : vector<64x1xf32> to vector<64x8xf32>
    %18 = arith.addf %15, %17 : vector<64x8xf32>
    %cst_12 = arith.constant 0.000000e+00 : f32
    %19 = vector.broadcast %cst_12 : f32 to vector<64x8xf32>
    %20 = arith.maximumf %18, %19 : vector<64x8xf32>
    %c0_13 = arith.constant 0 : index
    %c0_14 = arith.constant 0 : index
    %21 = vector.load %arg5[%c0_13, %c0_14] : memref<10x64xf32, #tpu.memory_space<vmem>>, vector<10x64xf32>
    %cst_15 = arith.constant dense<0.000000e+00> : vector<10x8xf32>
    %22 = tpu.matmul %21, %20, %cst_15 {dimension_numbers = #tpu.dot_dimension_numbers<[1], [0], [0], [1], [0, 0, 1, 1], [], []>} : vector<10x64xf32>, vector<64x8xf32>, vector<10x8xf32> -> vector<10x8xf32>
    %c0_16 = arith.constant 0 : index
    %c0_17 = arith.constant 0 : index
    %23 = vector.load %arg6[%c0_16, %c0_17] : memref<10x1xf32, #tpu.memory_space<vmem>>, vector<10x1xf32>
    %24 = vector.broadcast %23 : vector<10x1xf32> to vector<10x8xf32>
    %25 = arith.addf %22, %24 : vector<10x8xf32>
    %cst_18 = arith.constant 0.000000e+00 : f32
    %26 = vector.broadcast %cst_18 : f32 to vector<10x8xf32>
    %27 = arith.maximumf %25, %26 : vector<10x8xf32>
    %c0_19 = arith.constant 0 : index
    %c0_20 = arith.constant 0 : index
    %c0_21 = arith.constant 0 : index
    %28 = vector.load %arg7[%c0_19, %c0_20, %c0_21] : memref<2x10x8xf32, #tpu.memory_space<vmem>>, vector<1x10x8xf32>
    %29 = vector.shape_cast %28 : vector<1x10x8xf32> to vector<10x8xf32>
    %30 = vector.shape_cast %27 : vector<10x8xf32> to vector<1x10x8xf32>
    tpu.vector_store %arg7[%c0_19, %c0_20, %c0_21], %30 {strides = array<i32>} : memref<2x10x8xf32, #tpu.memory_space<vmem>>, vector<1x10x8xf32>,
    %c1 = arith.constant 1 : index
    %c0_22 = arith.constant 0 : index
    %c0_23 = arith.constant 0 : index
    %31 = vector.load %arg0[%c1, %c0_22, %c0_23] : memref<2x326x12xf32, #tpu.memory_space<vmem>>, vector<1x326x12xf32>
    %32 = vector.shape_cast %31 : vector<1x326x12xf32> to vector<326x12xf32>
    %c0_24 = arith.constant 0 : index
    %c0_25 = arith.constant 0 : index
    %33 = vector.load %arg1[%c0_24, %c0_25] : memref<12x8xf32, #tpu.memory_space<vmem>>, vector<12x8xf32>
    %cst_26 = arith.constant dense<0.000000e+00> : vector<326x8xf32>
    %34 = tpu.matmul %32, %33, %cst_26 {dimension_numbers = #tpu.dot_dimension_numbers<[1], [0], [0], [1], [0, 0, 1, 1], [], []>} : vector<326x12xf32>, vector<12x8xf32>, vector<326x8xf32> -> vector<326x8xf32>
    %c0_27 = arith.constant 0 : index
    %c0_28 = arith.constant 0 : index
    %35 = vector.load %arg2[%c0_27, %c0_28] : memref<1x8xf32, #tpu.memory_space<vmem>>, vector<1x8xf32>
    %36 = vector.broadcast %35 : vector<1x8xf32> to vector<326x8xf32>
    %37 = arith.addf %34, %36 : vector<326x8xf32>
    %cst_29 = arith.constant 0.000000e+00 : f32
    %38 = vector.broadcast %cst_29 : f32 to vector<326x8xf32>
    %39 = arith.maximumf %37, %38 : vector<326x8xf32>
    %40 = vector.extract_strided_slice %39 {offsets = [0, 0], sizes = [324, 8], strides = [1, 1]} : vector<326x8xf32> to vector<324x8xf32>
    %41 = vector.extract_strided_slice %39 {offsets = [1, 0], sizes = [324, 8], strides = [1, 1]} : vector<326x8xf32> to vector<324x8xf32>
    %42 = arith.maximumf %40, %41 : vector<324x8xf32>
    %43 = vector.extract_strided_slice %39 {offsets = [2, 0], sizes = [324, 8], strides = [1, 1]} : vector<326x8xf32> to vector<324x8xf32>
    %44 = arith.maximumf %42, %43 : vector<324x8xf32>
    %c0_30 = arith.constant 0 : index
    %c0_31 = arith.constant 0 : index
    %45 = vector.load %arg3[%c0_30, %c0_31] : memref<64x324xf32, #tpu.memory_space<vmem>>, vector<64x324xf32>
    %cst_32 = arith.constant dense<0.000000e+00> : vector<64x8xf32>
    %46 = tpu.matmul %45, %44, %cst_32 {dimension_numbers = #tpu.dot_dimension_numbers<[1], [0], [0], [1], [0, 0, 1, 1], [], []>} : vector<64x324xf32>, vector<324x8xf32>, vector<64x8xf32> -> vector<64x8xf32>
    %c0_33 = arith.constant 0 : index
    %c0_34 = arith.constant 0 : index
    %47 = vector.load %arg4[%c0_33, %c0_34] : memref<64x1xf32, #tpu.memory_space<vmem>>, vector<64x1xf32>
    %48 = vector.broadcast %47 : vector<64x1xf32> to vector<64x8xf32>
    %49 = arith.addf %46, %48 : vector<64x8xf32>
    %cst_35 = arith.constant 0.000000e+00 : f32
    %50 = vector.broadcast %cst_35 : f32 to vector<64x8xf32>
    %51 = arith.maximumf %49, %50 : vector<64x8xf32>
    %c0_36 = arith.constant 0 : index
    %c0_37 = arith.constant 0 : index
    %52 = vector.load %arg5[%c0_36, %c0_37] : memref<10x64xf32, #tpu.memory_space<vmem>>, vector<10x64xf32>
    %cst_38 = arith.constant dense<0.000000e+00> : vector<10x8xf32>
    %53 = tpu.matmul %52, %51, %cst_38 {dimension_numbers = #tpu.dot_dimension_numbers<[1], [0], [0], [1], [0, 0, 1, 1], [], []>} : vector<10x64xf32>, vector<64x8xf32>, vector<10x8xf32> -> vector<10x8xf32>
    %c0_39 = arith.constant 0 : index
    %c0_40 = arith.constant 0 : index
    %54 = vector.load %arg6[%c0_39, %c0_40] : memref<10x1xf32, #tpu.memory_space<vmem>>, vector<10x1xf32>
    %55 = vector.broadcast %54 : vector<10x1xf32> to vector<10x8xf32>
    %56 = arith.addf %53, %55 : vector<10x8xf32>
    %cst_41 = arith.constant 0.000000e+00 : f32
    %57 = vector.broadcast %cst_41 : f32 to vector<10x8xf32>
    %58 = arith.maximumf %56, %57 : vector<10x8xf32>
    %c1_42 = arith.constant 1 : index
    %c0_43 = arith.constant 0 : index
    %c0_44 = arith.constant 0 : index
    %59 = vector.load %arg7[%c1_42, %c0_43, %c0_44] : memref<2x10x8xf32, #tpu.memory_space<vmem>>, vector<1x10x8xf32>
    %60 = vector.shape_cast %59 : vector<1x10x8xf32> to vector<10x8xf32>
    %61 = vector.shape_cast %58 : vector<10x8xf32> to vector<1x10x8xf32>
    tpu.vector_store %arg7[%c1_42, %c0_43, %c0_44], %61 {strides = array<i32>} : memref<2x10x8xf32, #tpu.memory_space<vmem>>, vector<1x10x8xf32>,
    return
  }
}

</mosaic_0001>

<bundles_post_ra>
// kernel: tpu_custom_call.1
= control target key start
LH: loop header
LB: loop body
LE: loop exit
PB: predicated region body
PF: predicated region fallthrough
CT: control target
= control target key end

     0   :  { %vm200_vm0 = vcmask 1043456   ;;  %v3478_v0 = vmov 0.0|0.0   ;;  %vm3479_vm1 = vmmov 1   ;;  %vm3480_vm3 = vmmov 0   ;;  %s4711_s1 = inlined_call_operand.vmem [shape: f32[12,8], index: 1, kind: input, shape index: {}]   ;;  %s4712_s0 = inlined_call_operand.vmem [shape: f32[2,326,12], index: 0, kind: input, shape index: {}]   ;;  %s4713_s2 = inlined_call_operand.vmem [shape: f32[1,8], index: 2, kind: input, shape index: {}]   ;;  %s4714_s3 = inlined_call_operand.vmem [shape: f32[64,324], index: 3, kind: input, shape index: {}]   ;;  %s4715_s4 = inlined_call_operand.vmem [shape: f32[64,1], index: 4, kind: input, shape index: {}]   ;;  %s4716_s6 = inlined_call_operand.vmem [shape: f32[10,1], index: 6, kind: input, shape index: {}]   ;;  %s4717_s5 = inlined_call_operand.vmem [shape: f32[10,64], index: 5, kind: input, shape index: {}]   ;;  %s4718_s7 = inlined_call_operand.vmem [shape: f32[2,10,8], index: 7, kind: output, shape index: {}]  }
   0x1   :  { %3335 = vmatprep.subr.bf16.mxu0 %v3478_v0  ;;  %v67_v1 = vld [vmem:[%s4711_s1] sm:$0xff]  ;;  %v68_v2 = vld [vmem:[%s4711_s1 + $0x8] sm:$0xf]  ;;  %vm3531_vm2 = vmpackc.low %vm200_vm0, %vm3479_vm1  ;;  %v3481_v5 = vmov 0.0   ;;  %vm76_vm4 = vcmask 97280   ;;  %vm556_vm5 = vcmask 1046528  }
   0x2   :  { %v3336_v4 = vpack.c.bf16 %v68_v2, %v67_v1  ;;  %2987 = vmatprep.mubr.msk.f32.mxu0 %vm3480_vm3, %v3481_v5  ;;  %v26_v6 = vld [vmem:[%s4712_s0] sm:$0xff]  ;;  %v27_v7 = vld [vmem:[%s4712_s0 + $0x8] sm:$0xff]  ;;  %v28_v8 = vld [vmem:[%s4712_s0 + $0x10] sm:$0xff]  ;;  %vm720_vm6 = vcmask 1045504   ;;  %vm956_vm7 = vcmask 556032   ;;  %vm1216_vm8 = vcmask 523264  }
   0x3   :  { %v29_v9 = vld [vmem:[%s4712_s0 + $0x18] sm:$0xff]  ;;  %v30_v10 = vld [vmem:[%s4712_s0 + $0x20] sm:$0xff]  ;;  %v31_v11 = vld [vmem:[%s4712_s0 + $0x28] sm:$0xff]  ;;  %vm1302_vm9 = vcmask 58368   ;;  %vm1300_vm10 = vcmask 64512  }
   0x4   :  { %3338 = vmatpush3.bf16.msk.msra.mxu0 %vm3531_vm2, %v3336_v4  ;;  %v32_v12 = vld [vmem:[%s4712_s0 + $0x30] sm:$0xff]  ;;  %v33_v13 = vld [vmem:[%s4712_s0 + $0x38] sm:$0xff]  ;;  %v34_v14 = vld [vmem:[%s4712_s0 + $0x40] sm:$0xff] }
   0x5   :  { %v35_v15 = vld [vmem:[%s4712_s0 + $0x48] sm:$0xff]  ;;  %v36_v16 = vld [vmem:[%s4712_s0 + $0x50] sm:$0xff]  ;;  %v37_v17 = vld [vmem:[%s4712_s0 + $0x58] sm:$0xff] }
   0x6   :  { %v38_v18 = vld [vmem:[%s4712_s0 + $0x60] sm:$0xff]  ;;  %v39_v19 = vld [vmem:[%s4712_s0 + $0x68] sm:$0xff]  ;;  %v40_v20 = vld [vmem:[%s4712_s0 + $0x70] sm:$0xff] }
   0x7   :  { %2988 = vmatmul.mubr.msk.f32.vlgmr.msra.gmra.mrb[0].mxu0 %vm76_vm4, %v26_v6  ;;  %v41_v21 = vld [vmem:[%s4712_s0 + $0x78] sm:$0xff]  ;;  %v42_v22 = vld [vmem:[%s4712_s0 + $0x80] sm:$0xff]  ;;  %v43_v23 = vld [vmem:[%s4712_s0 + $0x88] sm:$0xff] }
   0x8   :  { %2990 = vmatprep.mubr.msk.f32.mxu0 %vm3480_vm3, %v3481_v5  ;;  %v44_v24 = vld [vmem:[%s4712_s0 + $0x90] sm:$0xff]  ;;  %v45_v25 = vld [vmem:[%s4712_s0 + $0x98] sm:$0xff]  ;;  %v46_v26 = vld [vmem:[%s4712_s0 + $0xa0] sm:$0xff] }
   0x9   :  { %v47_v27 = vld [vmem:[%s4712_s0 + $0xa8] sm:$0xff]  ;;  %v48_v28 = vld [vmem:[%s4712_s0 + $0xb0] sm:$0xff]  ;;  %v49_v29 = vld [vmem:[%s4712_s0 + $0xb8] sm:$0xff] }
   0xa   :  { %v50_v30 = vld [vmem:[%s4712_s0 + $0xc0] sm:$0xff]  ;;  %v51_v31 = vld [vmem:[%s4712_s0 + $0xc8] sm:$0xff]  ;;  %v52_v32 = vld [vmem:[%s4712_s0 + $0xd0] sm:$0xff] }
   0xb   :  { %2991 = vmatmul.mubr.msk.f32.gmra.mrb[2].mxu0 %vm76_vm4, %v27_v7  ;;  %v53_v33 = vld [vmem:[%s4712_s0 + $0xd8] sm:$0xff]  ;;  %v54_v34 = vld [vmem:[%s4712_s0 + $0xe0] sm:$0xff]  ;;  %v55_v35 = vld [vmem:[%s4712_s0 + $0xe8] sm:$0xff] }
   0xc   :  { %2993 = vmatprep.mubr.msk.f32.mxu0 %vm3480_vm3, %v3481_v5  ;;  %v56_v36 = vld [vmem:[%s4712_s0 + $0xf0] sm:$0xff]  ;;  %v57_v37 = vld [vmem:[%s4712_s0 + $0xf8] sm:$0xff]  ;;  %v58_v38 = vld [vmem:[%s4712_s0 + $0x100] sm:$0xff] }
   0xd   :  { %v59_v39 = vld [vmem:[%s4712_s0 + $0x108] sm:$0xff]  ;;  %v60_v40 = vld [vmem:[%s4712_s0 + $0x110] sm:$0xff]  ;;  %v61_v41 = vld [vmem:[%s4712_s0 + $0x118] sm:$0xff] }
   0xe   :  { %v62_v42 = vld [vmem:[%s4712_s0 + $0x120] sm:$0xff]  ;;  %v63_v43 = vld [vmem:[%s4712_s0 + $0x128] sm:$0xff]  ;;  %v64_v44 = vld [vmem:[%s4712_s0 + $0x130] sm:$0xff] }
   0xf   :  { %2994 = vmatmul.mubr.msk.f32.gmra.mrb[4].mxu0 %vm76_vm4, %v28_v8  ;;  %v65_v45 = vld [vmem:[%s4712_s0 + $0x138] sm:$0xff]  ;;  %v66_v46 = vld [vmem:[%s4712_s0 + $0x140] sm:$0x3f] }
  0x10   :  { %2996 = vmatprep.mubr.msk.f32.mxu0 %vm3480_vm3, %v3481_v5  ;;  %v3786_v47 = vld [vmem:[%s4713_s2] ss:$0 sm:$0xff]  ;;  %v2636_v3 = vld [vmem:[%s4712_s0 + $0x158] sm:$0xff] }
  0x13   :  { %2997 = vmatmul.mubr.msk.f32.gmra.mrb[6].mxu0 %vm76_vm4, %v29_v9 }
  0x14   :  { %2999 = vmatprep.mubr.msk.f32.mxu0 %vm3480_vm3, %v3481_v5 }
  0x17   :  { %3000 = vmatmul.mubr.msk.f32.gmra.mrb[8].mxu0 %vm76_vm4, %v30_v10 }
  0x18   :  { %3002 = vmatprep.mubr.msk.f32.mxu0 %vm3480_vm3, %v3481_v5 }
  0x1b   :  { %3003 = vmatmul.mubr.msk.f32.gmra.mrb[10].mxu0 %vm76_vm4, %v31_v11 }
  0x1c   :  { %3005 = vmatprep.mubr.msk.f32.mxu0 %vm3480_vm3, %v3481_v5 }
  0x1f   :  { %3006 = vmatmul.mubr.msk.f32.gmra.mrb[12].mxu0 %vm76_vm4, %v32_v12 }
  0x20   :  { %3008 = vmatprep.mubr.msk.f32.mxu0 %vm3480_vm3, %v3481_v5 }
  0x23   :  { %3009 = vmatmul.mubr.msk.f32.gmra.mrb[14].mxu0 %vm76_vm4, %v33_v13 }
  0x24   :  { %3011 = vmatprep.mubr.msk.f32.mxu0 %vm3480_vm3, %v3481_v5 }
  0x27   :  { %3012 = vmatmul.mubr.msk.f32.gmra.mrb[16].mxu0 %vm76_vm4, %v34_v14 }
  0x28   :  { %3014 = vmatprep.mubr.msk.f32.mxu0 %vm3480_vm3, %v3481_v5 }
  0x2b   :  { %3015 = vmatmul.mubr.msk.f32.gmra.mrb[18].mxu0 %vm76_vm4, %v35_v15 }
  0x2c   :  { %3017 = vmatprep.mubr.msk.f32.mxu0 %vm3480_vm3, %v3481_v5 }
  0x2f   :  { %3018 = vmatmul.mubr.msk.f32.gmra.mrb[20].mxu0 %vm76_vm4, %v36_v16 }
  0x30   :  { %3020 = vmatprep.mubr.msk.f32.mxu0 %vm3480_vm3, %v3481_v5 }
  0x33   :  { %3021 = vmatmul.mubr.msk.f32.gmra.mrb[22].mxu0 %vm76_vm4, %v37_v17 }
  0x34   :  { %3023 = vmatprep.mubr.msk.f32.mxu0 %vm3480_vm3, %v3481_v5 }
  0x37   :  { %3024 = vmatmul.mubr.msk.f32.gmra.mrb[24].mxu0 %vm76_vm4, %v38_v18 }
  0x38   :  { %3026 = vmatprep.mubr.msk.f32.mxu0 %vm3480_vm3, %v3481_v5 }
  0x3b   :  { %3027 = vmatmul.mubr.msk.f32.gmra.mrb[26].mxu0 %vm76_vm4, %v39_v19 }
  0x3c   :  { %3029 = vmatprep.mubr.msk.f32.mxu0 %vm3480_vm3, %v3481_v5 }
  0x3f   :  { %3030 = vmatmul.mubr.msk.f32.gmra.mrb[28].mxu0 %vm76_vm4, %v40_v20 }
  0x40   :  { %3032 = vmatprep.mubr.msk.f32.mxu0 %vm3480_vm3, %v3481_v5 }
  0x43   :  { %3033 = vmatmul.mubr.msk.f32.gmra.mrb[30].mxu0 %vm76_vm4, %v41_v21  ;;  %v885_v21 = vld [vmem:[%s4714_s3 + $0x8] sm:$0xff] }
  0x44   :  { %3035 = vmatprep.mubr.msk.f32.mxu0 %vm3480_vm3, %v3481_v5  ;;  %1048 = vmatprep.mubr.f32.mxu1 %v885_v21 }
  0x47   :  { %3036 = vmatmul.mubr.msk.f32.gmra.mrb[32].mxu0 %vm76_vm4, %v42_v22 }
  0x48   :  { %3038 = vmatprep.mubr.msk.f32.mxu0 %vm3480_vm3, %v3481_v5 }
  0x4b   :  { %3039 = vmatmul.mubr.msk.f32.gmra.mrb[34].mxu0 %vm76_vm4, %v43_v23 }
  0x4c   :  { %3041 = vmatprep.mubr.msk.f32.mxu0 %vm3480_vm3, %v3481_v5 }
  0x4f   :  { %3042 = vmatmul.mubr.msk.f32.gmra.mrb[36].mxu0 %vm76_vm4, %v44_v24 }
  0x50   :  { %3044 = vmatprep.mubr.msk.f32.mxu0 %vm3480_vm3, %v3481_v5 }
  0x53   :  { %3045 = vmatmul.mubr.msk.f32.gmra.mrb[38].mxu0 %vm76_vm4, %v45_v25 }
  0x54   :  { %3047 = vmatprep.mubr.msk.f32.mxu0 %vm3480_vm3, %v3481_v5 }
  0x57   :  { %3048 = vmatmul.mubr.msk.f32.gmra.mrb[40].mxu0 %vm76_vm4, %v46_v26 }
  0x58   :  { %3050 = vmatprep.mubr.msk.f32.mxu0 %vm3480_vm3, %v3481_v5 }
  0x5b   :  { %3051 = vmatmul.mubr.msk.f32.gmra.mrb[42].mxu0 %vm76_vm4, %v47_v27 }
  0x5c   :  { %3053 = vmatprep.mubr.msk.f32.mxu0 %vm3480_vm3, %v3481_v5 }
  0x5f   :  { %3054 = vmatmul.mubr.msk.f32.gmra.mrb[44].mxu0 %vm76_vm4, %v48_v28 }
  0x60   :  { %3056 = vmatprep.mubr.msk.f32.mxu0 %vm3480_vm3, %v3481_v5 }
  0x63   :  { %3057 = vmatmul.mubr.msk.f32.gmra.mrb[46].mxu0 %vm76_vm4, %v49_v29 }
  0x64   :  { %3059 = vmatprep.mubr.msk.f32.mxu0 %vm3480_vm3, %v3481_v5 }
  0x67   :  { %3060 = vmatmul.mubr.msk.f32.gmra.mrb[48].mxu0 %vm76_vm4, %v50_v30 }
  0x68   :  { %3062 = vmatprep.mubr.msk.f32.mxu0 %vm3480_vm3, %v3481_v5 }
  0x6b   :  { %3063 = vmatmul.mubr.msk.f32.gmra.mrb[50].mxu0 %vm76_vm4, %v51_v31 }
  0x6c   :  { %3065 = vmatprep.mubr.msk.f32.mxu0 %vm3480_vm3, %v3481_v5 }
  0x6f   :  { %3066 = vmatmul.mubr.msk.f32.gmra.mrb[52].mxu0 %vm76_vm4, %v52_v32 }
  0x70   :  { %3068 = vmatprep.mubr.msk.f32.mxu0 %vm3480_vm3, %v3481_v5 }
  0x73   :  { %3069 = vmatmul.mubr.msk.f32.gmra.mrb[54].mxu0 %vm76_vm4, %v53_v33 }
  0x74   :  { %3071 = vmatprep.mubr.msk.f32.mxu0 %vm3480_vm3, %v3481_v5 }
  0x77   :  { %3072 = vmatmul.mubr.msk.f32.gmra.mrb[56].mxu0 %vm76_vm4, %v54_v34 }
  0x78   :  { %3074 = vmatprep.mubr.msk.f32.mxu0 %vm3480_vm3, %v3481_v5 }
  0x7b   :  { %3075 = vmatmul.mubr.msk.f32.gmra.mrb[58].mxu0 %vm76_vm4, %v55_v35 }
  0x7c   :  { %3077 = vmatprep.mubr.msk.f32.mxu0 %vm3480_vm3, %v3481_v5 }
  0x7f   :  { %3078 = vmatmul.mubr.msk.f32.gmra.mrb[60].mxu0 %vm76_vm4, %v56_v36 }
  0x80   :  { %3080 = vmatprep.mubr.msk.f32.mxu0 %vm3480_vm3, %v3481_v5 }
  0x83   :  { %3081 = vmatmul.mubr.msk.f32.gmra.mrb[62].mxu0 %vm76_vm4, %v57_v37 }
  0x84   :  { %3083 = vmatprep.mubr.msk.f32.mxu0 %vm3480_vm3, %v3481_v5 }
  0x87   :  { %3084 = vmatmul.mubr.msk.f32.gmra.mrb[64].mxu0 %vm76_vm4, %v58_v38 }
  0x88   :  { %3086 = vmatprep.mubr.msk.f32.mxu0 %vm3480_vm3, %v3481_v5 }
  0x8b   :  { %3087 = vmatmul.mubr.msk.f32.gmra.mrb[66].mxu0 %vm76_vm4, %v59_v39 }
  0x8c   :  { %3089 = vmatprep.mubr.msk.f32.mxu0 %vm3480_vm3, %v3481_v5 }
  0x8f   :  { %3090 = vmatmul.mubr.msk.f32.gmra.mrb[68].mxu0 %vm76_vm4, %v60_v40 }
  0x90   :  { %3092 = vmatprep.mubr.msk.f32.mxu0 %vm3480_vm3, %v3481_v5 }
  0x93   :  { %3093 = vmatmul.mubr.msk.f32.gmra.mrb[70].mxu0 %vm76_vm4, %v61_v41 }
  0x94   :  { %3095 = vmatprep.mubr.msk.f32.mxu0 %vm3480_vm3, %v3481_v5 }
  0x97   :  { %3096 = vmatmul.mubr.msk.f32.gmra.mrb[72].mxu0 %vm76_vm4, %v62_v42 }
  0x98   :  { %3098 = vmatprep.mubr.msk.f32.mxu0 %vm3480_vm3, %v3481_v5 }
  0x9b   :  { %3099 = vmatmul.mubr.msk.f32.gmra.mrb[74].mxu0 %vm76_vm4, %v63_v43 }
  0x9c   :  { %3101 = vmatprep.mubr.msk.f32.mxu0 %vm3480_vm3, %v3481_v5 }
  0x9f   :  { %3102 = vmatmul.mubr.msk.f32.gmra.mrb[76].mxu0 %vm76_vm4, %v64_v44 }
  0xa0   :  { %3104 = vmatprep.mubr.msk.f32.mxu0 %vm3480_vm3, %v3481_v5 }
  0xa3   :  { %3105 = vmatmul.mubr.msk.f32.gmra.mrb[78].mxu0 %vm76_vm4, %v65_v45 }
  0xa4   :  { %3107 = vmatprep.mubr.msk.f32.mxu0 %vm3480_vm3, %v3481_v5 }
  0xa7   :  { %3108 = vmatmul.mubr.msk.f32.gmra.mrb[80].mxu0 %vm76_vm4, %v66_v46 }
  0xda   :  { %v270_v48 = vpop.f32.mrb[0].mxu0 }
  0xdb   :  { %v271_v49 = vadd.f32 %v3786_v47, %v270_v48  ;;  %v2989_v50 = vpop.f32.mrb[1].mxu0 }
  0xdd   :  { %v474_v51 = vmax.f32 %v271_v49, 0.0 }
  0xde   :  { %v275_v52 = vpop.f32.mrb[2].mxu0 }
  0xdf   :  { %v276_v53 = vadd.f32 %v3786_v47, %v275_v52  ;;  %v2992_v54 = vpop.f32.mrb[3].mxu0  ;;  %v557_v56 = vrot.slane %v474_v51, 1  ;;  %v721_v58 = vrot.slane %v474_v51, 2 }
  0xe1   :  { %v475_v55 = vmax.f32 %v276_v53, 0.0 }
  0xe2   :  { %v280_v57 = vpop.f32.mrb[4].mxu0 }
  0xe3   :  { %v558_v59 = vrot.slane %v475_v55, 1  ;;  %v722_v60 = vrot.slane %v475_v55, 2  ;;  %v281_v61 = vadd.f32 %v3786_v47, %v280_v57  ;;  %v2995_v62 = vpop.f32.mrb[5].mxu0 }
  0xe5   :  { %v476_v63 = vmax.f32 %v281_v61, 0.0  ;;  %v559_v1 = vsel %vm556_vm5, %v557_v56, %v558_v59  ;;  %v723_v2 = vsel %vm720_vm6, %v721_v58, %v722_v60 }
  0xe6   :  { %v285_v4 = vpop.f32.mrb[6].mxu0  ;;  %v679_v6 = vmax.f32 %v474_v51, %v559_v1 }
  0xe7   :  { %v560_v7 = vrot.slane %v476_v63, 1  ;;  %v724_v8 = vrot.slane %v476_v63, 2  ;;  %v286_v9 = vadd.f32 %v3786_v47, %v285_v4  ;;  %v2998_v10 = vpop.f32.mrb[7].mxu0 }
  0xe8   :  { %v3794_v11 = vmax.f32 %v679_v6, %v723_v2 }
  0xe9   :  { %v477_v12 = vmax.f32 %v286_v9, 0.0  ;;  %v561_v13 = vsel %vm556_vm5, %v558_v59, %v560_v7  ;;  %v725_v14 = vsel %vm720_vm6, %v722_v60, %v724_v8 }
  0xea   :  { %v290_v15 = vpop.f32.mrb[8].mxu0  ;;  %v680_v16 = vmax.f32 %v475_v55, %v561_v13 }
  0xeb   :  { %v562_v17 = vrot.slane %v477_v12, 1  ;;  %v726_v18 = vrot.slane %v477_v12, 2  ;;  %v291_v19 = vadd.f32 %v3786_v47, %v290_v15  ;;  %v3001_v20 = vpop.f32.mrb[9].mxu0 }
  0xec   :  { %v3802_v22 = vmax.f32 %v680_v16, %v725_v14 }
  0xed   :  { %v478_v23 = vmax.f32 %v291_v19, 0.0  ;;  %v563_v24 = vsel %vm556_vm5, %v560_v7, %v562_v17  ;;  %v727_v25 = vsel %vm720_vm6, %v724_v8, %v726_v18 }
  0xee   :  { %v295_v26 = vpop.f32.mrb[10].mxu0  ;;  %v3341_v27 = vpack.c.bf16 %v3802_v22, %v3794_v11  ;;  %v681_v28 = vmax.f32 %v476_v63, %v563_v24 }
  0xef   :  { %v564_v29 = vrot.slane %v478_v23, 1  ;;  %v728_v30 = vrot.slane %v478_v23, 2  ;;  %v296_v31 = vadd.f32 %v3786_v47, %v295_v26  ;;  %v3004_v32 = vpop.f32.mrb[11].mxu0 }
  0xf0   :  { %v3809_v33 = vmax.f32 %v681_v28, %v727_v25 }
  0xf1   :  { %v479_v34 = vmax.f32 %v296_v31, 0.0  ;;  %v565_v35 = vsel %vm556_vm5, %v562_v17, %v564_v29  ;;  %v729_v36 = vsel %vm720_vm6, %v726_v18, %v728_v30 }
  0xf2   :  { %v300_v37 = vpop.f32.mrb[12].mxu0  ;;  %v682_v38 = vmax.f32 %v477_v12, %v565_v35 }
  0xf3   :  { %v566_v39 = vrot.slane %v479_v34, 1  ;;  %v730_v40 = vrot.slane %v479_v34, 2  ;;  %v301_v41 = vadd.f32 %v3786_v47, %v300_v37  ;;  %v3007_v42 = vpop.f32.mrb[13].mxu0 }
  0xf4   :  { %v3814_v43 = vmax.f32 %v682_v38, %v729_v36 }
  0xf5   :  { %v480_v44 = vmax.f32 %v301_v41, 0.0  ;;  %v567_v45 = vsel %vm556_vm5, %v564_v29, %v566_v39  ;;  %v731_v46 = vsel %vm720_vm6, %v728_v30, %v730_v40 }
  0xf6   :  { %v305_v48 = vpop.f32.mrb[14].mxu0  ;;  %v3345_v49 = vpack.c.bf16 %v3814_v43, %v3809_v33  ;;  %v683_v50 = vmax.f32 %v478_v23, %v567_v45 }
  0xf7   :  { %v568_v51 = vrot.slane %v480_v44, 1  ;;  %v732_v52 = vrot.slane %v480_v44, 2  ;;  %v306_v53 = vadd.f32 %v3786_v47, %v305_v48  ;;  %v3010_v54 = vpop.f32.mrb[15].mxu0 }
  0xf8   :  { %v3821_v55 = vmax.f32 %v683_v50, %v731_v46 }
  0xf9   :  { %v481_v56 = vmax.f32 %v306_v53, 0.0  ;;  %v569_v57 = vsel %vm556_vm5, %v566_v39, %v568_v51  ;;  %v733_v58 = vsel %vm720_vm6, %v730_v40, %v732_v52 }
  0xfa   :  { %v310_v59 = vpop.f32.mrb[16].mxu0  ;;  %v684_v60 = vmax.f32 %v479_v34, %v569_v57 }
  0xfb   :  { %v570_v61 = vrot.slane %v481_v56, 1  ;;  %v734_v62 = vrot.slane %v481_v56, 2  ;;  %v311_v63 = vadd.f32 %v3786_v47, %v310_v59  ;;  %v3013_v1 = vpop.f32.mrb[17].mxu0 }
  0xfc   :  { %v3826_v2 = vmax.f32 %v684_v60, %v733_v58 }
  0xfd   :  { %v482_v4 = vmax.f32 %v311_v63, 0.0  ;;  %v571_v6 = vsel %vm556_vm5, %v568_v51, %v570_v61  ;;  %v735_v7 = vsel %vm720_vm6, %v732_v52, %v734_v62 }
  0xfe   :  { %v315_v8 = vpop.f32.mrb[18].mxu0  ;;  %v3349_v9 = vpack.c.bf16 %v3826_v2, %v3821_v55  ;;  %v685_v10 = vmax.f32 %v480_v44, %v571_v6 }
  0xff   :  { %v572_v12 = vrot.slane %v482_v4, 1  ;;  %v736_v13 = vrot.slane %v482_v4, 2  ;;  %v316_v14 = vadd.f32 %v3786_v47, %v315_v8  ;;  %v3016_v15 = vpop.f32.mrb[19].mxu0 }
 0x100   :  { %v3833_v16 = vmax.f32 %v685_v10, %v735_v7 }
 0x101   :  { %v483_v17 = vmax.f32 %v316_v14, 0.0  ;;  %v573_v18 = vsel %vm556_vm5, %v570_v61, %v572_v12  ;;  %v737_v19 = vsel %vm720_vm6, %v734_v62, %v736_v13 }
 0x102   :  { %v320_v20 = vpop.f32.mrb[20].mxu0  ;;  %v686_v21 = vmax.f32 %v481_v56, %v573_v18 }
 0x103   :  { %v574_v23 = vrot.slane %v483_v17, 1  ;;  %v738_v24 = vrot.slane %v483_v17, 2  ;;  %v321_v25 = vadd.f32 %v3786_v47, %v320_v20  ;;  %v3019_v26 = vpop.f32.mrb[21].mxu0 }
 0x104   :  { %v3838_v28 = vmax.f32 %v686_v21, %v737_v19 }
 0x105   :  { %v484_v29 = vmax.f32 %v321_v25, 0.0  ;;  %v575_v30 = vsel %vm556_vm5, %v572_v12, %v574_v23  ;;  %v739_v31 = vsel %vm720_vm6, %v736_v13, %v738_v24 }
 0x106   :  { %v325_v32 = vpop.f32.mrb[22].mxu0  ;;  %v3353_v34 = vpack.c.bf16 %v3838_v28, %v3833_v16  ;;  %v687_v35 = vmax.f32 %v482_v4, %v575_v30 }
 0x107   :  { %v576_v36 = vrot.slane %v484_v29, 1  ;;  %v740_v37 = vrot.slane %v484_v29, 2  ;;  %v326_v38 = vadd.f32 %v3786_v47, %v325_v32  ;;  %v3022_v39 = vpop.f32.mrb[23].mxu0 }
 0x108   :  { %v3845_v40 = vmax.f32 %v687_v35, %v739_v31 }
 0x109   :  { %v485_v41 = vmax.f32 %v326_v38, 0.0  ;;  %v577_v42 = vsel %vm556_vm5, %v574_v23, %v576_v36  ;;  %v741_v44 = vsel %vm720_vm6, %v738_v24, %v740_v37 }
 0x10a   :  { %v330_v45 = vpop.f32.mrb[24].mxu0  ;;  %v688_v46 = vmax.f32 %v483_v17, %v577_v42 }
 0x10b   :  { %v578_v48 = vrot.slane %v485_v41, 1  ;;  %v742_v50 = vrot.slane %v485_v41, 2  ;;  %v331_v51 = vadd.f32 %v3786_v47, %v330_v45  ;;  %v3025_v52 = vpop.f32.mrb[25].mxu0 }
 0x10c   :  { %v3850_v53 = vmax.f32 %v688_v46, %v741_v44  ;;  %v3482_v46 = vmov 0  }
 0x10d   :  { %v486_v54 = vmax.f32 %v331_v51, 0.0  ;;  %v579_v56 = vsel %vm556_vm5, %v576_v36, %v578_v48  ;;  %v743_v57 = vsel %vm720_vm6, %v740_v37, %v742_v50  ;;  %3476 = vset.pattern.permute.xlu0 %v3482_v46  ;;  %3477 = vset.pattern.permute.xlu1 %v3482_v46 }
 0x10e   :  { %v335_v58 = vpop.f32.mrb[26].mxu0  ;;  %v3357_v59 = vpack.c.bf16 %v3850_v53, %v3845_v40  ;;  %v689_v60 = vmax.f32 %v484_v29, %v579_v56 }
 0x10f   :  { %v580_v61 = vrot.slane %v486_v54, 1  ;;  %v744_v62 = vrot.slane %v486_v54, 2  ;;  %v336_v63 = vadd.f32 %v3786_v47, %v335_v58  ;;  %v3028_v1 = vpop.f32.mrb[27].mxu0  ;;  %v3893_v58 = vld [vmem:[%s4715_s4 + $0x18] sm:$0xff] }
 0x110   :  { %v3857_v4 = vmax.f32 %v689_v60, %v743_v57  ;;  %v909_v57 = vld [vmem:[%s4715_s4 + $0x8] sm:$0xff] }
 0x111   :  { %v487_v6 = vmax.f32 %v336_v63, 0.0  ;;  %v581_v7 = vsel %vm556_vm5, %v578_v48, %v580_v61  ;;  %v745_v8 = vsel %vm720_vm6, %v742_v50, %v744_v62  ;;  %v908_v48 = vld [vmem:[%s4715_s4] sm:$0xff]  ;;  %v3880_v50 = vld [vmem:[%s4715_s4 + $0x10] sm:$0xff] }
 0x112   :  { %v340_v10 = vpop.f32.mrb[28].mxu0  ;;  %v690_v12 = vmax.f32 %v485_v41, %v581_v7  ;;  %918 = vperm.xlu0 %3476, %v908_v48   ;;  %928 = vperm.xlu1 %3477, %v3880_v50  }
 0x113   :  { %v582_v13 = vrot.slane %v487_v6, 1  ;;  %v746_v14 = vrot.slane %v487_v6, 2  ;;  %v341_v15 = vadd.f32 %v3786_v47, %v340_v10  ;;  %v3031_v17 = vpop.f32.mrb[29].mxu0 }
 0x114   :  { %v3862_v18 = vmax.f32 %v690_v12, %v745_v8 }
 0x115   :  { %v488_v19 = vmax.f32 %v341_v15, 0.0  ;;  %v583_v20 = vsel %vm556_vm5, %v580_v61, %v582_v13  ;;  %v747_v21 = vsel %vm720_vm6, %v744_v62, %v746_v14  ;;  %v3911_v15 = vld [vmem:[%s4715_s4 + $0x28] sm:$0xff] }
 0x116   :  { %v345_v23 = vpop.f32.mrb[30].mxu0  ;;  %v3361_v24 = vpack.c.bf16 %v3862_v18, %v3857_v4  ;;  %v691_v25 = vmax.f32 %v486_v54, %v583_v20  ;;  %923 = vperm.xlu0 %3476, %v909_v57   ;;  %933 = vperm.xlu1 %3477, %v3893_v58  }
 0x117   :  { %v584_v26 = vrot.slane %v488_v19, 1  ;;  %v748_v29 = vrot.slane %v488_v19, 2  ;;  %v346_v30 = vadd.f32 %v3786_v47, %v345_v23  ;;  %v3034_v31 = vpop.f32.mrb[31].mxu0 }
 0x118   :  { %v3869_v32 = vmax.f32 %v691_v25, %v747_v21 }
 0x119   :  { %v489_v35 = vmax.f32 %v346_v30, 0.0  ;;  %v585_v36 = vsel %vm556_vm5, %v582_v13, %v584_v26  ;;  %v749_v37 = vsel %vm720_vm6, %v746_v14, %v748_v29  ;;  %v3906_v14 = vld [vmem:[%s4715_s4 + $0x20] sm:$0xff] }
 0x11a   :  { %v350_v38 = vpop.f32.mrb[32].mxu0  ;;  %v692_v39 = vmax.f32 %v487_v6, %v585_v36  ;;  %938 = vperm.xlu0 %3476, %v3906_v14   ;;  %943 = vperm.xlu1 %3477, %v3911_v15   ;;  %v3928_v36 = vld [vmem:[%s4715_s4 + $0x38] sm:$0xff] }
 0x11b   :  { %v586_v41 = vrot.slane %v489_v35, 1  ;;  %v750_v42 = vrot.slane %v489_v35, 2  ;;  %v351_v44 = vadd.f32 %v3786_v47, %v350_v38  ;;  %v3037_v45 = vpop.f32.mrb[33].mxu0 }
 0x11c   :  { %v3882_v51 = vmax.f32 %v692_v39, %v749_v37 }
 0x11d   :  { %v490_v52 = vmax.f32 %v351_v44, 0.0  ;;  %v587_v54 = vsel %vm556_vm5, %v584_v26, %v586_v41  ;;  %v751_v56 = vsel %vm720_vm6, %v748_v29, %v750_v42 }
 0x11e   :  { %v355_v60 = vpop.f32.mrb[34].mxu0  ;;  %v3365_v61 = vpack.c.bf16 %v3882_v51, %v3869_v32  ;;  %v693_v62 = vmax.f32 %v488_v19, %v587_v54  ;;  %953 = vperm.xlu1 %3477, %v3928_v36  }
 0x11f   :  { %v588_v63 = vrot.slane %v490_v52, 1  ;;  %v752_v1 = vrot.slane %v490_v52, 2  ;;  %v356_v6 = vadd.f32 %v3786_v47, %v355_v60  ;;  %v3040_v7 = vpop.f32.mrb[35].mxu0 }
 0x120   :  { %v3898_v8 = vmax.f32 %v693_v62, %v751_v56 }
 0x121   :  { %v491_v10 = vmax.f32 %v356_v6, 0.0  ;;  %v589_v12 = vsel %vm556_vm5, %v586_v41, %v588_v63  ;;  %v753_v13 = vsel %vm720_vm6, %v750_v42, %v752_v1 }
 0x122   :  { %v360_v17 = vpop.f32.mrb[36].mxu0  ;;  %v694_v19 = vmax.f32 %v489_v35, %v589_v12  ;;  %v3923_v35 = vld [vmem:[%s4715_s4 + $0x30] sm:$0xff]  ;;  %2198 = vperm.xlu1 %3477, %v909_v57  }
 0x123   :  { %v590_v20 = vrot.slane %v491_v10, 1  ;;  %v754_v21 = vrot.slane %v491_v10, 2  ;;  %v361_v23 = vadd.f32 %v3786_v47, %v360_v17  ;;  %v3043_v25 = vpop.f32.mrb[37].mxu0  ;;  %948 = vperm.xlu0 %3476, %v3923_v35  }
 0x124   :  { %v3914_v26 = vmax.f32 %v694_v19, %v753_v13 }
 0x125   :  { %v492_v29 = vmax.f32 %v361_v23, 0.0  ;;  %v591_v30 = vsel %vm556_vm5, %v588_v63, %v590_v20  ;;  %v755_v31 = vsel %vm720_vm6, %v752_v1, %v754_v21 }
 0x126   :  { %v365_v37 = vpop.f32.mrb[38].mxu0  ;;  %v695_v38 = vmax.f32 %v490_v52, %v591_v30  ;;  %v3369_v39 = vpack.c.bf16 %v3914_v26, %v3898_v8  ;;  %2208 = vperm.xlu1 %3477, %v3893_v58  }
 0x127   :  { %v592_v41 = vrot.slane %v492_v29, 1  ;;  %v756_v42 = vrot.slane %v492_v29, 2  ;;  %v366_v44 = vadd.f32 %v3786_v47, %v365_v37  ;;  %v3046_v45 = vpop.f32.mrb[39].mxu0  ;;  %2193 = vperm.xlu0 %3476, %v908_v48  }
 0x128   :  { %v859_v46 = vmax.f32 %v695_v38, %v755_v31 }
 0x129   :  { %v493_v54 = vmax.f32 %v366_v44, 0.0  ;;  %v593_v56 = vsel %vm556_vm5, %v590_v20, %v592_v41  ;;  %v757_v60 = vsel %vm720_vm6, %v754_v21, %v756_v42 }
 0x12a   :  { %v370_v62 = vpop.f32.mrb[40].mxu0  ;;  %v696_v52 = vmax.f32 %v491_v10, %v593_v56  ;;  %2218 = vperm.xlu1 %3477, %v3911_v15  }
 0x12b   :  { %v594_v63 = vrot.slane %v493_v54, 1  ;;  %v758_v1 = vrot.slane %v493_v54, 2  ;;  %v371_v6 = vadd.f32 %v3786_v47, %v370_v62  ;;  %v3049_v7 = vpop.f32.mrb[41].mxu0  ;;  %2203 = vperm.xlu0 %3476, %v3880_v50  }
 0x12c   :  { %v860_v12 = vmax.f32 %v696_v52, %v757_v60  ;;  %v1204_v7 = vld [vmem:[%s4716_s6] sm:$0xff] }
 0x12d   :  { %v494_v13 = vmax.f32 %v371_v6, 0.0  ;;  %v595_v17 = vsel %vm556_vm5, %v592_v41, %v594_v63  ;;  %v759_v19 = vsel %vm720_vm6, %v756_v42, %v758_v1 }
 0x12e   :  { %v375_v23 = vpop.f32.mrb[42].mxu0  ;;  %v3339_v25 = vpack.c.bf16 %v860_v12, %v859_v46  ;;  %v697_v20 = vmax.f32 %v492_v29, %v595_v17  ;;  %2228 = vperm.xlu1 %3477, %v3928_v36  }
 0x12f   :  { %v596_v30 = vrot.slane %v494_v13, 1  ;;  %v760_v21 = vrot.slane %v494_v13, 2  ;;  %v376_v10 = vadd.f32 %v3786_v47, %v375_v23  ;;  %v3052_v31 = vpop.f32.mrb[43].mxu0  ;;  %2213 = vperm.xlu0 %3476, %v3906_v14  }
 0x130   :  { %3340 = vmatprep.subr.bf16.mxu1 %v3339_v25  ;;  %v861_v37 = vmax.f32 %v697_v20, %v759_v19 }
 0x131   :  { %v495_v38 = vmax.f32 %v376_v10, 0.0  ;;  %3342 = vmatpush3.bf16.msra.mxu1 %v3341_v27  ;;  %v597_v48 = vsel %vm556_vm5, %v594_v63, %v596_v30  ;;  %v761_v57 = vsel %vm720_vm6, %v758_v1, %v760_v21  ;;  %v2479_v10 = vld [vmem:[%s4716_s6 + $0x8] sm:$0x3] }
 0x132   :  { %v380_v29 = vpop.f32.mrb[44].mxu0  ;;  %v698_v41 = vmax.f32 %v493_v54, %v597_v48 }
 0x133   :  { %v598_v42 = vrot.slane %v495_v38, 1  ;;  %v762_v44 = vrot.slane %v495_v38, 2  ;;  %v381_v45 = vadd.f32 %v3786_v47, %v380_v29  ;;  %v3055_v46 = vpop.f32.mrb[45].mxu0  ;;  %2223 = vperm.xlu0 %3476, %v3923_v35   ;;  %v1205_v35 = vld [vmem:[%s4716_s6 + $0x8] sm:$0x3] }
 0x134   :  { %v862_v56 = vmax.f32 %v698_v41, %v761_v57  ;;  %1213 = vperm.xlu1 %3477, %v1205_v35  }
 0x135   :  { %v496_v50 = vmax.f32 %v381_v45, 0.0  ;;  %v599_v11 = vsel %vm556_vm5, %v596_v30, %v598_v42  ;;  %v763_v22 = vsel %vm720_vm6, %v760_v21, %v762_v44 }
 0x136   :  { %v385_v27 = vpop.f32.mrb[46].mxu0  ;;  %v3343_v60 = vpack.c.bf16 %v862_v56, %v861_v37  ;;  %v699_v58 = vmax.f32 %v494_v13, %v599_v11 }
 0x137   :  { %v600_v62 = vrot.slane %v496_v50, 1  ;;  %v764_v54 = vrot.slane %v496_v50, 2  ;;  %v386_v52 = vadd.f32 %v3786_v47, %v385_v27  ;;  %v3058_v63 = vpop.f32.mrb[47].mxu0  ;;  %1208 = vperm.xlu0 %3476, %v1204_v7  }
 0x138   :  { %3344 = vmatprep.subr.bf16.mxu1 %v3343_v60  ;;  %v863_v1 = vmax.f32 %v699_v58, %v763_v22  ;;  %2487 = vperm.xlu1 %3477, %v2479_v10  }
 0x139   :  { %v497_v14 = vmax.f32 %v386_v52, 0.0  ;;  %3346 = vmatpush3.bf16.msra.mxu1 %v3345_v49  ;;  %v601_v6 = vsel %vm556_vm5, %v598_v42, %v600_v62  ;;  %v765_v15 = vsel %vm720_vm6, %v762_v44, %v764_v54 }
 0x13a   :  { %v390_v12 = vpop.f32.mrb[48].mxu0  ;;  %v700_v13 = vmax.f32 %v495_v38, %v601_v6 }
 0x13b   :  { %v602_v17 = vrot.slane %v497_v14, 1  ;;  %v766_v19 = vrot.slane %v497_v14, 2  ;;  %v391_v33 = vadd.f32 %v3786_v47, %v390_v12  ;;  %v3061_v43 = vpop.f32.mrb[49].mxu0  ;;  %2482 = vperm.xlu0 %3476, %v1204_v7  }
 0x13c   :  { %v864_v49 = vmax.f32 %v700_v13, %v765_v15 }
 0x13d   :  { %v498_v23 = vmax.f32 %v391_v33, 0.0  ;;  %v603_v36 = vsel %vm556_vm5, %v600_v62, %v602_v17  ;;  %v767_v25 = vsel %vm720_vm6, %v764_v54, %v766_v19 }
 0x13e   :  { %v395_v20 = vpop.f32.mrb[50].mxu0  ;;  %v3347_v30 = vpack.c.bf16 %v864_v49, %v863_v1  ;;  %v701_v21 = vmax.f32 %v496_v50, %v603_v36 }
 0x13f   :  { %v604_v31 = vrot.slane %v498_v23, 1  ;;  %v768_v37 = vrot.slane %v498_v23, 2  ;;  %v396_v38 = vadd.f32 %v3786_v47, %v395_v20  ;;  %v3064_v48 = vpop.f32.mrb[51].mxu0 }
 0x140   :  { %3348 = vmatprep.subr.bf16.mxu1 %v3347_v30  ;;  %v865_v57 = vmax.f32 %v701_v21, %v767_v25 }
 0x141   :  { %v499_v29 = vmax.f32 %v396_v38, 0.0  ;;  %3350 = vmatpush3.bf16.msra.mxu1 %v3349_v9  ;;  %v605_v41 = vsel %vm556_vm5, %v602_v17, %v604_v31  ;;  %v769_v42 = vsel %vm720_vm6, %v766_v19, %v768_v37 }
 0x142   :  { %v400_v44 = vpop.f32.mrb[52].mxu0  ;;  %v702_v45 = vmax.f32 %v497_v14, %v605_v41 }
 0x143   :  { %v606_v46 = vrot.slane %v499_v29, 1  ;;  %v770_v56 = vrot.slane %v499_v29, 2  ;;  %v401_v50 = vadd.f32 %v3786_v47, %v400_v44  ;;  %v3067_v11 = vpop.f32.mrb[53].mxu0 }
 0x144   :  { %v866_v22 = vmax.f32 %v702_v45, %v769_v42 }
 0x145   :  { %v500_v27 = vmax.f32 %v401_v50, 0.0  ;;  %v607_v60 = vsel %vm556_vm5, %v604_v31, %v606_v46  ;;  %v771_v58 = vsel %vm720_vm6, %v768_v37, %v770_v56 }
 0x146   :  { %v405_v55 = vpop.f32.mrb[54].mxu0  ;;  %v3351_v2 = vpack.c.bf16 %v866_v22, %v865_v57  ;;  %v703_v9 = vmax.f32 %v498_v23, %v607_v60 }
 0x147   :  { %v608_v62 = vrot.slane %v500_v27, 1  ;;  %v772_v54 = vrot.slane %v500_v27, 2  ;;  %v406_v52 = vadd.f32 %v3786_v47, %v405_v55  ;;  %v3070_v63 = vpop.f32.mrb[55].mxu0 }
 0x148   :  { %3352 = vmatprep.subr.bf16.mxu1 %v3351_v2  ;;  %v867_v1 = vmax.f32 %v703_v9, %v771_v58 }
 0x149   :  { %v501_v14 = vmax.f32 %v406_v52, 0.0  ;;  %3354 = vmatpush3.bf16.msra.mxu1 %v3353_v34  ;;  %v609_v6 = vsel %vm556_vm5, %v606_v46, %v608_v62  ;;  %v773_v15 = vsel %vm720_vm6, %v770_v56, %v772_v54 }
 0x14a   :  { %v410_v7 = vpop.f32.mrb[56].mxu0  ;;  %v704_v12 = vmax.f32 %v499_v29, %v609_v6 }
 0x14b   :  { %v610_v13 = vrot.slane %v501_v14, 1  ;;  %v774_v35 = vrot.slane %v501_v14, 2  ;;  %v411_v17 = vadd.f32 %v3786_v47, %v410_v7  ;;  %v3073_v19 = vpop.f32.mrb[57].mxu0 }
 0x14c   :  { %v868_v33 = vmax.f32 %v704_v12, %v773_v15 }
 0x14d   :  { %v502_v43 = vmax.f32 %v411_v17, 0.0  ;;  %v611_v49 = vsel %vm556_vm5, %v608_v62, %v610_v13  ;;  %v775_v23 = vsel %vm720_vm6, %v772_v54, %v774_v35 }
 0x14e   :  { %v415_v36 = vpop.f32.mrb[58].mxu0  ;;  %v3355_v16 = vpack.c.bf16 %v868_v33, %v867_v1  ;;  %v705_v28 = vmax.f32 %v500_v27, %v611_v49 }
 0x14f   :  { %v612_v34 = vrot.slane %v502_v43, 1  ;;  %v776_v25 = vrot.slane %v502_v43, 2  ;;  %v416_v20 = vadd.f32 %v3786_v47, %v415_v36  ;;  %v3076_v30 = vpop.f32.mrb[59].mxu0 }
 0x150   :  { %3356 = vmatprep.subr.bf16.mxu1 %v3355_v16  ;;  %v869_v21 = vmax.f32 %v705_v28, %v775_v23 }
 0x151   :  { %v503_v10 = vmax.f32 %v416_v20, 0.0  ;;  %3358 = vmatpush3.bf16.msra.mxu1 %v3357_v59  ;;  %v613_v31 = vsel %vm556_vm5, %v610_v13, %v612_v34  ;;  %v777_v37 = vsel %vm720_vm6, %v774_v35, %v776_v25 }
 0x152   :  { %v420_v38 = vpop.f32.mrb[60].mxu0  ;;  %v706_v48 = vmax.f32 %v501_v14, %v613_v31 }
 0x153   :  { %v614_v57 = vrot.slane %v503_v10, 1  ;;  %v778_v29 = vrot.slane %v503_v10, 2  ;;  %v421_v41 = vadd.f32 %v3786_v47, %v420_v38  ;;  %v3079_v42 = vpop.f32.mrb[61].mxu0 }
 0x154   :  { %v870_v44 = vmax.f32 %v706_v48, %v777_v37 }
 0x155   :  { %v504_v45 = vmax.f32 %v421_v41, 0.0  ;;  %v615_v46 = vsel %vm556_vm5, %v612_v34, %v614_v57  ;;  %v779_v56 = vsel %vm720_vm6, %v776_v25, %v778_v29  ;;  %v884_v41 = vld [vmem:[%s4714_s3] sm:$0xff] }
 0x156   :  { %v425_v50 = vpop.f32.mrb[62].mxu0  ;;  %v3359_v40 = vpack.c.bf16 %v870_v44, %v869_v21  ;;  %v707_v53 = vmax.f32 %v502_v43, %v615_v46  ;;  %v888_v46 = vld [vmem:[%s4714_s3 + $0x20] sm:$0xff] }
 0x157   :  { %v616_v59 = vrot.slane %v504_v45, 1  ;;  %v780_v11 = vrot.slane %v504_v45, 2  ;;  %v426_v22 = vadd.f32 %v3786_v47, %v425_v50  ;;  %v3082_v27 = vpop.f32.mrb[63].mxu0 }
 0x158   :  { %3360 = vmatprep.subr.bf16.mxu1 %v3359_v40  ;;  %v871_v60 = vmax.f32 %v707_v53, %v779_v56 }
 0x159   :  { %v505_v58 = vmax.f32 %v426_v22, 0.0  ;;  %3362 = vmatpush3.bf16.msra.mxu1 %v3361_v24  ;;  %v617_v55 = vsel %vm556_vm5, %v614_v57, %v616_v59  ;;  %v781_v2 = vsel %vm720_vm6, %v778_v29, %v780_v11 }
 0x15a   :  { %v430_v9 = vpop.f32.mrb[64].mxu0  ;;  %v708_v62 = vmax.f32 %v503_v10, %v617_v55 }
 0x15b   :  { %v618_v54 = vrot.slane %v505_v58, 1  ;;  %v782_v52 = vrot.slane %v505_v58, 2  ;;  %v431_v63 = vadd.f32 %v3786_v47, %v430_v9  ;;  %v3085_v1 = vpop.f32.mrb[65].mxu0 }
 0x15c   :  { %v872_v14 = vmax.f32 %v708_v62, %v781_v2  ;;  %v890_v1 = vld [vmem:[%s4714_s3 + $0x30] sm:$0xff] }
 0x15d   :  { %v506_v6 = vmax.f32 %v431_v63, 0.0  ;;  %v619_v15 = vsel %vm556_vm5, %v616_v59, %v618_v54  ;;  %v783_v7 = vsel %vm720_vm6, %v780_v11, %v782_v52  ;;  %v887_v59 = vld [vmem:[%s4714_s3 + $0x18] sm:$0xff] }
 0x15e   :  { %v435_v12 = vpop.f32.mrb[66].mxu0  ;;  %v3363_v4 = vpack.c.bf16 %v872_v14, %v871_v60  ;;  %v709_v18 = vmax.f32 %v504_v45, %v619_v15 }
 0x15f   :  { %v620_v24 = vrot.slane %v506_v6, 1  ;;  %v784_v13 = vrot.slane %v506_v6, 2  ;;  %v436_v35 = vadd.f32 %v3786_v47, %v435_v12  ;;  %v3088_v17 = vpop.f32.mrb[67].mxu0 }
 0x160   :  { %3364 = vmatprep.subr.bf16.mxu1 %v3363_v4  ;;  %v873_v19 = vmax.f32 %v709_v18, %v783_v7  ;;  %v894_v7 = vld [vmem:[%s4714_s3 + $0x50] sm:$0xff] }
 0x161   :  { %v507_v33 = vmax.f32 %v436_v35, 0.0  ;;  %3366 = vmatpush3.bf16.msra.mxu1 %v3365_v61  ;;  %v621_v43 = vsel %vm556_vm5, %v618_v54, %v620_v24  ;;  %v785_v49 = vsel %vm720_vm6, %v782_v52, %v784_v13 }
 0x162   :  { %v440_v23 = vpop.f32.mrb[68].mxu0  ;;  %v710_v36 = vmax.f32 %v505_v58, %v621_v43  ;;  %v891_v58 = vld [vmem:[%s4714_s3 + $0x38] sm:$0xff] }
 0x163   :  { %v622_v16 = vrot.slane %v507_v33, 1  ;;  %v786_v28 = vrot.slane %v507_v33, 2  ;;  %v441_v34 = vadd.f32 %v3786_v47, %v440_v23  ;;  %v3091_v25 = vpop.f32.mrb[69].mxu0 }
 0x164   :  { %v874_v20 = vmax.f32 %v710_v36, %v785_v49  ;;  %v897_v36 = vld [vmem:[%s4714_s3 + $0x68] sm:$0xff] }
 0x165   :  { %v508_v30 = vmax.f32 %v441_v34, 0.0  ;;  %v623_v21 = vsel %vm556_vm5, %v620_v24, %v622_v16  ;;  %v787_v10 = vsel %vm720_vm6, %v784_v13, %v786_v28 }
 0x166   :  { %v445_v31 = vpop.f32.mrb[70].mxu0  ;;  %v3367_v32 = vpack.c.bf16 %v874_v20, %v873_v19  ;;  %v711_v51 = vmax.f32 %v506_v6, %v623_v21  ;;  %v893_v19 = vld [vmem:[%s4714_s3 + $0x48] sm:$0xff] }
 0x167   :  { %v624_v61 = vrot.slane %v508_v30, 1  ;;  %v788_v37 = vrot.slane %v508_v30, 2  ;;  %v446_v38 = vadd.f32 %v3786_v47, %v445_v31  ;;  %v3094_v48 = vpop.f32.mrb[71].mxu0 }
 0x168   :  { %3368 = vmatprep.subr.bf16.mxu1 %v3367_v32  ;;  %v875_v57 = vmax.f32 %v711_v51, %v787_v10  ;;  %v896_v10 = vld [vmem:[%s4714_s3 + $0x60] sm:$0xff] }
 0x169   :  { %v509_v29 = vmax.f32 %v446_v38, 0.0  ;;  %3370 = vmatpush3.bf16.msra.mxu1 %v3369_v39  ;;  %v625_v42 = vsel %vm556_vm5, %v622_v16, %v624_v61  ;;  %v789_v44 = vsel %vm720_vm6, %v786_v28, %v788_v37 }
 0x16a   :  { %v450_v45 = vpop.f32.mrb[72].mxu0  ;;  %v712_v56 = vmax.f32 %v507_v33, %v625_v42 }
 0x16b   :  { %v626_v50 = vrot.slane %v509_v29, 1  ;;  %v790_v40 = vrot.slane %v509_v29, 2  ;;  %v451_v53 = vadd.f32 %v3786_v47, %v450_v45  ;;  %v3097_v8 = vpop.f32.mrb[73].mxu0 }
 0x16c   :  { %1049 = vmatmul.mubr.f32.vlgmr.msra.gmra.mrb[0].mxu1 %v884_v41  ;;  %v876_v26 = vmax.f32 %v712_v56, %v789_v44  ;;  %v899_v44 = vld [vmem:[%s4714_s3 + $0x78] sm:$0xff] }
 0x16d   :  { %v510_v39 = vmax.f32 %v451_v53, 0.0  ;;  %1053 = vmatprep.mubr.f32.mxu1 %v888_v46  ;;  %v627_v11 = vsel %vm556_vm5, %v624_v61, %v626_v50  ;;  %v791_v22 = vsel %vm720_vm6, %v788_v37, %v790_v40  ;;  %v900_v61 = vld [vmem:[%s4714_s3 + $0x80] sm:$0xff] }
 0x16e   :  { %v455_v27 = vpop.f32.mrb[74].mxu0  ;;  %v3371_v60 = vpack.c.bf16 %v876_v26, %v875_v57  ;;  %v713_v55 = vmax.f32 %v508_v30, %v627_v11  ;;  %v902_v26 = vld [vmem:[%s4714_s3 + $0x90] sm:$0xff] }
 0x16f   :  { %v628_v2 = vrot.slane %v510_v39, 1  ;;  %v792_v9 = vrot.slane %v510_v39, 2  ;;  %v456_v62 = vadd.f32 %v3786_v47, %v455_v27  ;;  %v3100_v54 = vpop.f32.mrb[75].mxu0  ;;  %v906_v11 = vld [vmem:[%s4714_s3 + $0xb0] sm:$0xff] }
 0x170   :  { %3372 = vmatprep.subr.bf16.mxu1 %v3371_v60  ;;  %1054 = vmatmul.mubr.f32.gmra.mrb[2].mxu1 %v887_v59  ;;  %v877_v52 = vmax.f32 %v713_v55, %v791_v22  ;;  %v892_v54 = vld [vmem:[%s4714_s3 + $0x40] sm:$0xff] }
 0x171   :  { %v511_v63 = vmax.f32 %v456_v62, 0.0  ;;  %3374 = vmatpush3.bf16.msra.mxu1 %v3371_v60  ;;  %1058 = vmatprep.mubr.f32.mxu1 %v891_v58  ;;  %v629_v14 = vsel %vm556_vm5, %v626_v50, %v628_v2  ;;  %v793_v6 = vsel %vm720_vm6, %v790_v40, %v792_v9  ;;  %v903_v50 = vld [vmem:[%s4714_s3 + $0x98] sm:$0xff]  ;;  %v905_v58 = vld [vmem:[%s4714_s3 + $0xa8] sm:$0xff] }
 0x172   :  { %v460_v15 = vpop.f32.mrb[76].mxu0  ;;  %v714_v12 = vmax.f32 %v509_v29, %v629_v14  ;;  %v889_v62 = vld [vmem:[%s4714_s3 + $0x28] sm:$0xff]  ;;  %v904_v14 = vld [vmem:[%s4714_s3 + $0xa0] sm:$0xff] }
 0x173   :  { %v630_v4 = vrot.slane %v511_v63, 1  ;;  %v794_v18 = vrot.slane %v511_v63, 2  ;;  %v461_v24 = vadd.f32 %v3786_v47, %v460_v15  ;;  %v3103_v13 = vpop.f32.mrb[77].mxu0  ;;  %v1202_v15 = vld [vmem:[%s4717_s5] sm:$0xff] }
 0x174   :  { %1059 = vmatmul.mubr.f32.gmra.mrb[4].mxu1 %v890_v1  ;;  %v878_v35 = vmax.f32 %v714_v12, %v793_v6  ;;  %v901_v1 = vld [vmem:[%s4714_s3 + $0x88] sm:$0xff]  ;;  %v907_v6 = vld [vmem:[%s4714_s3 + $0xb8] sm:$0xff] }
 0x175   :  { %v512_v17 = vmax.f32 %v461_v24, 0.0  ;;  %1063 = vmatprep.mubr.f32.mxu1 %v894_v7  ;;  %v631_v33 = vsel %vm556_vm5, %v628_v2, %v630_v4  ;;  %v795_v43 = vsel %vm720_vm6, %v792_v9, %v794_v18  ;;  %v886_v2 = vld [vmem:[%s4714_s3 + $0x10] sm:$0xff] }
 0x176   :  { %v465_v49 = vpop.f32.mrb[78].mxu0  ;;  %v3375_v23 = vpack.c.bf16 %v878_v35, %v877_v52  ;;  %v715_v16 = vmax.f32 %v510_v39, %v631_v33  ;;  %v895_v52 = vld [vmem:[%s4714_s3 + $0x58] sm:$0xff] }
 0x177   :  { %v632_v28 = vrot.slane %v512_v17, 1  ;;  %v796_v34 = vrot.slane %v512_v17, 2  ;;  %v466_v25 = vadd.f32 %v3786_v47, %v465_v49  ;;  %v3106_v20 = vpop.f32.mrb[79].mxu0 }
 0x178   :  { %3376 = vmatprep.subr.bf16.mxu1 %v3375_v23  ;;  %1064 = vmatmul.mubr.f32.gmra.mrb[6].mxu1 %v893_v19  ;;  %v879_v30 = vmax.f32 %v715_v16, %v795_v43 }
 0x179   :  { %v513_v21 = vmax.f32 %v466_v25, 0.0  ;;  %3378 = vmatpush3.bf16.msra.mxu1 %v3375_v23  ;;  %1068 = vmatprep.mubr.f32.mxu1 %v897_v36  ;;  %v633_v31 = vsel %vm556_vm5, %v630_v4, %v632_v28  ;;  %v797_v32 = vsel %vm720_vm6, %v794_v18, %v796_v34 }
 0x17a   :  { %v470_v51 = vpop.f32.mrb[80].mxu0  ;;  %v716_v37 = vmax.f32 %v511_v63, %v633_v31  ;;  %v898_v63 = vld [vmem:[%s4714_s3 + $0x70] sm:$0xff] }
 0x17b   :  { %v634_v38 = vrot.slane %v513_v21, 1  ;;  %v798_v48 = vrot.slane %v513_v21, 2  ;;  %v471_v57 = vadd.f32 %v3786_v47, %v470_v51  ;;  %v3109_v29 = vpop.f32.mrb[81].mxu0 }
 0x17c   :  { %1069 = vmatmul.mubr.f32.gmra.mrb[8].mxu1 %v896_v10  ;;  %v880_v41 = vmax.f32 %v716_v37, %v797_v32 }
 0x17d   :  { %v514_v42 = vmax.f32 %v471_v57, 0.0  ;;  %1073 = vmatprep.mubr.f32.mxu1 %v900_v61  ;;  %v635_v45 = vsel %vm556_vm5, %v632_v28, %v634_v38  ;;  %v799_v46 = vsel %vm720_vm6, %v796_v34, %v798_v48 }
 0x17e   :  { %v3379_v56 = vpack.c.bf16 %v880_v41, %v879_v30  ;;  %v717_v40 = vmax.f32 %v512_v17, %v635_v45 }
 0x17f   :  { %v636_v47 = vrot.slane %v514_v42, 1  ;;  %v800_v53 = vrot.slane %v514_v42, 2 }
 0x180   :  { %3380 = vmatprep.subr.bf16.mxu1 %v3379_v56  ;;  %1074 = vmatmul.mubr.f32.gmra.mrb[10].mxu1 %v899_v44  ;;  %v881_v8 = vmax.f32 %v717_v40, %v799_v46 }
 0x181   :  { %3382 = vmatpush3.bf16.msra.mxu1 %v3379_v56  ;;  %1078 = vmatprep.mubr.f32.mxu1 %v903_v50  ;;  %v637_v39 = vsel %vm556_vm5, %v634_v38, %v636_v47  ;;  %v801_v59 = vsel %vm720_vm6, %v798_v48, %v800_v53  ;;  %v719_v27 = vmax.f32 %v514_v42, %v636_v47 }
 0x182   :  { %v718_v22 = vmax.f32 %v513_v21, %v637_v39 }
 0x183   :  { %v883_v9 = vmax.f32 %v719_v27, %v800_v53 }
 0x184   :  { %1079 = vmatmul.mubr.f32.gmra.mrb[12].mxu1 %v902_v26  ;;  %v882_v60 = vmax.f32 %v718_v22, %v801_v59 }
 0x185   :  { %1083 = vmatprep.mubr.f32.mxu1 %v906_v11 }
 0x186   :  { %v3383_v55 = vpack.c.bf16 %v882_v60, %v881_v8 }
 0x188   :  { %3384 = vmatprep.subr.bf16.mxu1 %v3383_v55  ;;  %1084 = vmatmul.mubr.f32.gmra.mrb[14].mxu1 %v905_v58 }
 0x189   :  { %3386 = vmatpush3.bf16.msra.mxu1 %v3383_v55  ;;  %3128 = vmatprep.mubr.msk.f32.mxu1 %vm956_vm7, %v886_v2 }
 0x18a   :  { %3126 = vmatprep.subr.msk.mxu1 %vm200_vm0, %v883_v9 }
 0x18d   :  { %3127 = vmatpush3.msk.msra.mxu1 %vm200_vm0, %v883_v9 }
 0x18e   :  { %3129 = vmatmul.mubr.msk.f32.vlgmr.msra.gmra.mrb[16].mxu1 %vm956_vm7, %v889_v62 }
 0x18f   :  { %3131 = vmatprep.mubr.msk.f32.mxu1 %vm956_vm7, %v892_v54 }
 0x191   :  { %v919_v21 = vpop.permute.xlu0 %918  ;;  %v929_v10 = vpop.permute.xlu1 %928 }
 0x192   :  { %3132 = vmatmul.mubr.msk.f32.gmra.mrb[18].mxu1 %vm956_vm7, %v895_v52 }
 0x193   :  { %3134 = vmatprep.mubr.msk.f32.mxu1 %vm956_vm7, %v898_v63 }
 0x195   :  { %v924_v37 = vpop.permute.xlu0 %923  ;;  %v934_v38 = vpop.permute.xlu1 %933 }
 0x196   :  { %3135 = vmatmul.mubr.msk.f32.gmra.mrb[20].mxu1 %vm956_vm7, %v901_v1 }
 0x197   :  { %3137 = vmatprep.mubr.msk.f32.mxu1 %vm956_vm7, %v904_v14 }
 0x199   :  { %v944_v56 = vpop.permute.xlu1 %943  ;;  %v939_v53 = vpop.permute.xlu0 %938 }
 0x19a   :  { %3138 = vmatmul.mubr.msk.f32.gmra.mrb[22].mxu1 %vm956_vm7, %v907_v6 }
 0x19b   :  { %3156 = vmatprep.mubr.msk.f32.mxu1 %vm1216_vm8, %v1202_v15 }
 0x19d   :  { %v954_v9 = vpop.permute.xlu1 %953 }
 0x1a2   :  { %v949_v52 = vpop.permute.xlu0 %948 }
 0x23f   :  { %v2806_v7 = vpop.f32.mrb[0].mxu1 }
 0x240   :  { %v2807_v12 = vpop.f32.mrb[1].mxu1 }
 0x241   :  { %v2808_v4 = vadd.f32 %v2807_v12, %v2806_v7 }
 0x243   :  { %v2809_v18 = vpop.f32.mrb[2].mxu1  ;;  %v1051_v29 = vadd.f32 %v2808_v4, %v919_v21  ;;  %v2645_v21 = vld [vmem:[%s4712_s0 + $0x1a0] sm:$0xff] }
 0x244   :  { %v2810_v24 = vpop.f32.mrb[3].mxu1 }
 0x245   :  { %v2811_v13 = vadd.f32 %v2810_v24, %v2809_v18 }
 0x247   :  { %v2812_v35 = vpop.f32.mrb[4].mxu1  ;;  %v1056_v48 = vadd.f32 %v2811_v13, %v924_v37  ;;  %v2651_v37 = vld [vmem:[%s4712_s0 + $0x1d0] sm:$0xff] }
 0x248   :  { %v2813_v17 = vpop.f32.mrb[5].mxu1 }
 0x249   :  { %v2814_v19 = vadd.f32 %v2813_v17, %v2812_v35  ;;  %v1346_v17 = vld [vmem:[%s4711_s1] sm:$0xff] }
 0x24b   :  { %v2815_v33 = vpop.f32.mrb[6].mxu1  ;;  %v1061_v47 = vadd.f32 %v2814_v19, %v929_v10  ;;  %v1347_v19 = vld [vmem:[%s4711_s1 + $0x8] sm:$0xf] }
 0x24c   :  { %v2816_v43 = vpop.f32.mrb[7].mxu1  ;;  %v2646_v10 = vld [vmem:[%s4712_s0 + $0x1a8] sm:$0xff] }
 0x24d   :  { %v2817_v49 = vadd.f32 %v2816_v43, %v2815_v33  ;;  %v1203_v33 = vld [vmem:[%s4717_s5 + $0x8] sm:$0x3]  ;;  %v3404_v43 = vpack.c.bf16 %v1347_v19, %v1346_v17 }
 0x24f   :  { %v2818_v23 = vpop.f32.mrb[8].mxu1  ;;  %v1066_v46 = vadd.f32 %v2817_v49, %v934_v38  ;;  %v2634_v49 = vld [vmem:[%s4712_s0 + $0x148] sm:$0xff]  ;;  %v2652_v38 = vld [vmem:[%s4712_s0 + $0x1d8] sm:$0xff] }
 0x250   :  { %v2819_v36 = vpop.f32.mrb[9].mxu1 }
 0x251   :  { %v2820_v16 = vadd.f32 %v2819_v36, %v2818_v23  ;;  %v2637_v23 = vld [vmem:[%s4712_s0 + $0x160] sm:$0xff]  ;;  %v2638_v36 = vld [vmem:[%s4712_s0 + $0x168] sm:$0xff] }
 0x253   :  { %v2821_v28 = vpop.f32.mrb[10].mxu1  ;;  %v1071_v58 = vadd.f32 %v2820_v16, %v939_v53  ;;  %v2639_v16 = vld [vmem:[%s4712_s0 + $0x170] sm:$0xff]  ;;  %v2665_v53 = vld [vmem:[%s4712_s0 + $0x240] sm:$0xff] }
 0x254   :  { %v2822_v34 = vpop.f32.mrb[11].mxu1 }
 0x255   :  { %v2823_v25 = vadd.f32 %v2822_v34, %v2821_v28  ;;  %v2640_v28 = vld [vmem:[%s4712_s0 + $0x178] sm:$0xff]  ;;  %v2641_v34 = vld [vmem:[%s4712_s0 + $0x180] sm:$0xff] }
 0x257   :  { %v2824_v20 = vpop.f32.mrb[12].mxu1  ;;  %v1076_v22 = vadd.f32 %v2823_v25, %v944_v56  ;;  %v2642_v25 = vld [vmem:[%s4712_s0 + $0x188] sm:$0xff]  ;;  %v2661_v56 = vld [vmem:[%s4712_s0 + $0x220] sm:$0xff] }
 0x258   :  { %v2825_v30 = vpop.f32.mrb[13].mxu1 }
 0x259   :  { %v2826_v31 = vadd.f32 %v2825_v30, %v2824_v20  ;;  %v2643_v20 = vld [vmem:[%s4712_s0 + $0x190] sm:$0xff]  ;;  %v2644_v30 = vld [vmem:[%s4712_s0 + $0x198] sm:$0xff] }
 0x25b   :  { %v2827_v32 = vpop.f32.mrb[14].mxu1  ;;  %v1081_v15 = vadd.f32 %v2826_v31, %v949_v52  ;;  %v2647_v31 = vld [vmem:[%s4712_s0 + $0x1b0] sm:$0xff] }
 0x25c   :  { %v2828_v51 = vpop.f32.mrb[15].mxu1 }
 0x25d   :  { %v2829_v61 = vadd.f32 %v2828_v51, %v2827_v32  ;;  %v2648_v32 = vld [vmem:[%s4712_s0 + $0x1b8] sm:$0xff]  ;;  %v2649_v51 = vld [vmem:[%s4712_s0 + $0x1c0] sm:$0xff] }
 0x25f   :  { %v1086_v1 = vadd.f32 %v2829_v61, %v954_v9  ;;  %v2650_v61 = vld [vmem:[%s4712_s0 + $0x1c8] sm:$0xff] }
 0x261   :  { %v3130_v57 = vpop.f32.mrb[16].mxu1 }
 0x262   :  { %v1161_v41 = vadd.f32 %v3130_v57, %v1056_v48  ;;  %v1155_v42 = vpop.f32.mrb[17].mxu1  ;;  %v2653_v48 = vld [vmem:[%s4712_s0 + $0x1e0] sm:$0xff]  ;;  %v2654_v57 = vld [vmem:[%s4712_s0 + $0x1e8] sm:$0xff] }
 0x263   :  { %v1156_v44 = vadd.f32 %v1155_v42, %v1051_v29  ;;  %v2655_v29 = vld [vmem:[%s4712_s0 + $0x1f0] sm:$0xff]  ;;  %v2657_v42 = vld [vmem:[%s4712_s0 + $0x200] sm:$0xff] }
 0x264   :  { %v1195_v45 = vmax.f32 %v1161_v41, 0.0  ;;  %v2656_v41 = vld [vmem:[%s4712_s0 + $0x1f8] sm:$0xff] }
 0x265   :  { %v1194_v50 = vmax.f32 %v1156_v44, 0.0  ;;  %v3133_v40 = vpop.f32.mrb[18].mxu1  ;;  %v2658_v44 = vld [vmem:[%s4712_s0 + $0x208] sm:$0xff] }
 0x266   :  { %v1171_v8 = vadd.f32 %v3133_v40, %v1066_v46  ;;  %v1165_v26 = vpop.f32.mrb[19].mxu1  ;;  %v2660_v46 = vld [vmem:[%s4712_s0 + $0x218] sm:$0xff]  ;;  %v2663_v40 = vld [vmem:[%s4712_s0 + $0x230] sm:$0xff] }
 0x267   :  { %v3387_v39 = vpack.c.bf16 %v1195_v45, %v1194_v50  ;;  %v1166_v59 = vadd.f32 %v1165_v26, %v1061_v47  ;;  %v2659_v45 = vld [vmem:[%s4712_s0 + $0x210] sm:$0xff]  ;;  %v2662_v50 = vld [vmem:[%s4712_s0 + $0x228] sm:$0xff]  ;;  %v2664_v47 = vld [vmem:[%s4712_s0 + $0x238] sm:$0xff] }
 0x268   :  { %v1197_v11 = vmax.f32 %v1171_v8, 0.0  ;;  %v2666_v8 = vld [vmem:[%s4712_s0 + $0x248] sm:$0xff]  ;;  %v2667_v26 = vld [vmem:[%s4712_s0 + $0x250] sm:$0xff] }
 0x269   :  { %v1196_v27 = vmax.f32 %v1166_v59, 0.0  ;;  %v3136_v60 = vpop.f32.mrb[20].mxu1  ;;  %3388 = vmatprep.subr.bf16.mxu1 %v3387_v39  ;;  %v2669_v59 = vld [vmem:[%s4712_s0 + $0x260] sm:$0xff] }
 0x26a   :  { %v1181_v55 = vadd.f32 %v3136_v60, %v1076_v22  ;;  %v1175_v2 = vpop.f32.mrb[21].mxu1  ;;  %3390 = vmatpush3.bf16.msra.mxu1 %v3387_v39  ;;  %v2668_v39 = vld [vmem:[%s4712_s0 + $0x258] sm:$0xff]  ;;  %v2671_v22 = vld [vmem:[%s4712_s0 + $0x270] sm:$0xff]  ;;  %v2673_v60 = vld [vmem:[%s4712_s0 + $0x280] sm:$0xff] }
 0x26b   :  { %v3391_v62 = vpack.c.bf16 %v1197_v11, %v1196_v27  ;;  %v1176_v54 = vadd.f32 %v1175_v2, %v1071_v58  ;;  %v2670_v11 = vld [vmem:[%s4712_s0 + $0x268] sm:$0xff]  ;;  %v2672_v27 = vld [vmem:[%s4712_s0 + $0x278] sm:$0xff]  ;;  %v4385_v2 = vpop.permute.xlu0 %2193 }
 0x26c   :  { %v1199_v63 = vmax.f32 %v1181_v55, 0.0  ;;  %v2674_v58 = vld [vmem:[%s4712_s0 + $0x288] sm:$0x3f]  ;;  %v4383_v55 = vpop.permute.xlu1 %2198 }
 0x26d   :  { %v1198_v14 = vmax.f32 %v1176_v54, 0.0  ;;  %v3139_v6 = vpop.f32.mrb[22].mxu1  ;;  %3392 = vmatprep.subr.bf16.mxu1 %v3391_v62 }
 0x26e   :  { %v1191_v7 = vadd.f32 %v3139_v6, %v1086_v1  ;;  %v1185_v12 = vpop.f32.mrb[23].mxu1  ;;  %3394 = vmatpush3.bf16.msra.mxu1 %v3391_v62 }
 0x26f   :  { %v3395_v4 = vpack.c.bf16 %v1199_v63, %v1198_v14  ;;  %v1186_v18 = vadd.f32 %v1185_v12, %v1081_v15  ;;  %v4389_v62 = vpop.permute.xlu0 %2203 }
 0x270   :  { %v1201_v24 = vmax.f32 %v1191_v7, 0.0  ;;  %v4387_v9 = vpop.permute.xlu1 %2208 }
 0x271   :  { %v1200_v13 = vmax.f32 %v1186_v18, 0.0  ;;  %3396 = vmatprep.subr.bf16.mxu1 %v3395_v4 }
 0x272   :  { %3398 = vmatpush3.bf16.msra.mxu1 %v3395_v4  ;;  %v4402_v4 = vld [vmem:[%s4713_s2] ss:$0 sm:$0xff] }
 0x273   :  { %v3399_v35 = vpack.c.bf16 %v1201_v24, %v1200_v13  ;;  %v4393_v52 = vpop.permute.xlu0 %2213 }
 0x274   :  { %v4391_v54 = vpop.permute.xlu1 %2218 }
 0x275   :  { %3400 = vmatprep.subr.bf16.mxu1 %v3399_v35 }
 0x276   :  { %3402 = vmatpush3.bf16.msra.mxu1 %v3399_v35 }
 0x277   :  { %3403 = vmatprep.subr.bf16.mxu1 %v3478_v0  ;;  %v2635_v0 = vld [vmem:[%s4712_s0 + $0x150] sm:$0xff] }
 0x278   :  { %v4395_v63 = vpop.permute.xlu1 %2228 }
 0x279   :  { %3157 = vmatmul.mubr.msk.f32.vlgmr.msra.gmra.mrb[24].mxu1 %vm1216_vm8, %v1203_v33 }
 0x27a   :  { %3406 = vmatpush3.bf16.msk.msra.mxu1 %vm3531_vm2, %v3404_v43  ;;  %3163 = vmatprep.mubr.msk.f32.mxu1 %vm3480_vm3, %v3481_v5 }
 0x27c   :  { %v1214_v1 = vpop.permute.xlu1 %1213 }
 0x27d   :  { %3164 = vmatmul.mubr.msk.f32.vlgmr.msra.gmra.mrb[26].mxu1 %vm76_vm4, %v2634_v49 }
 0x27e   :  { %3166 = vmatprep.mubr.msk.f32.mxu1 %vm3480_vm3, %v3481_v5 }
 0x281   :  { %3167 = vmatmul.mubr.msk.f32.gmra.mrb[28].mxu1 %vm76_vm4, %v2635_v0 }
 0x282   :  { %3169 = vmatprep.mubr.msk.f32.mxu1 %vm3480_vm3, %v3481_v5 }
 0x285   :  { %3170 = vmatmul.mubr.msk.f32.gmra.mrb[30].mxu1 %vm76_vm4, %v2636_v3 }
 0x286   :  { %3172 = vmatprep.mubr.msk.f32.mxu1 %vm3480_vm3, %v3481_v5 }
 0x289   :  { %3173 = vmatmul.mubr.msk.f32.gmra.mrb[32].mxu1 %vm76_vm4, %v2637_v23 }
 0x28a   :  { %3175 = vmatprep.mubr.msk.f32.mxu1 %vm3480_vm3, %v3481_v5 }
 0x28d   :  { %3176 = vmatmul.mubr.msk.f32.gmra.mrb[34].mxu1 %vm76_vm4, %v2638_v36 }
 0x28e   :  { %3178 = vmatprep.mubr.msk.f32.mxu1 %vm3480_vm3, %v3481_v5 }
 0x291   :  { %3179 = vmatmul.mubr.msk.f32.gmra.mrb[36].mxu1 %vm76_vm4, %v2639_v16 }
 0x292   :  { %3181 = vmatprep.mubr.msk.f32.mxu1 %vm3480_vm3, %v3481_v5 }
 0x295   :  { %3182 = vmatmul.mubr.msk.f32.gmra.mrb[38].mxu1 %vm76_vm4, %v2640_v28 }
 0x296   :  { %3184 = vmatprep.mubr.msk.f32.mxu1 %vm3480_vm3, %v3481_v5 }
 0x299   :  { %3185 = vmatmul.mubr.msk.f32.gmra.mrb[40].mxu1 %vm76_vm4, %v2641_v34 }
 0x29a   :  { %3187 = vmatprep.mubr.msk.f32.mxu1 %vm3480_vm3, %v3481_v5 }
 0x29d   :  { %3188 = vmatmul.mubr.msk.f32.gmra.mrb[42].mxu1 %vm76_vm4, %v2642_v25 }
 0x29e   :  { %3190 = vmatprep.mubr.msk.f32.mxu1 %vm3480_vm3, %v3481_v5 }
 0x2a1   :  { %3191 = vmatmul.mubr.msk.f32.gmra.mrb[44].mxu1 %vm76_vm4, %v2643_v20 }
 0x2a2   :  { %3193 = vmatprep.mubr.msk.f32.mxu1 %vm3480_vm3, %v3481_v5 }
 0x2a5   :  { %3194 = vmatmul.mubr.msk.f32.gmra.mrb[46].mxu1 %vm76_vm4, %v2644_v30 }
 0x2a6   :  { %3196 = vmatprep.mubr.msk.f32.mxu1 %vm3480_vm3, %v3481_v5 }
 0x2a9   :  { %3197 = vmatmul.mubr.msk.f32.gmra.mrb[48].mxu1 %vm76_vm4, %v2645_v21 }
 0x2aa   :  { %3199 = vmatprep.mubr.msk.f32.mxu1 %vm3480_vm3, %v3481_v5 }
 0x2ad   :  { %3200 = vmatmul.mubr.msk.f32.gmra.mrb[50].mxu1 %vm76_vm4, %v2646_v10 }
 0x2ae   :  { %3202 = vmatprep.mubr.msk.f32.mxu1 %vm3480_vm3, %v3481_v5 }
 0x2b1   :  { %3203 = vmatmul.mubr.msk.f32.gmra.mrb[52].mxu1 %vm76_vm4, %v2647_v31 }
 0x2b2   :  { %3205 = vmatprep.mubr.msk.f32.mxu1 %vm3480_vm3, %v3481_v5 }
 0x2b5   :  { %3206 = vmatmul.mubr.msk.f32.gmra.mrb[54].mxu1 %vm76_vm4, %v2648_v32 }
 0x2b6   :  { %3208 = vmatprep.mubr.msk.f32.mxu1 %vm3480_vm3, %v3481_v5 }
 0x2b9   :  { %3209 = vmatmul.mubr.msk.f32.gmra.mrb[56].mxu1 %vm76_vm4, %v2649_v51 }
 0x2ba   :  { %3211 = vmatprep.mubr.msk.f32.mxu1 %vm3480_vm3, %v3481_v5 }
 0x2bd   :  { %3212 = vmatmul.mubr.msk.f32.gmra.mrb[58].mxu1 %vm76_vm4, %v2650_v61 }
 0x2be   :  { %3214 = vmatprep.mubr.msk.f32.mxu1 %vm3480_vm3, %v3481_v5 }
 0x2c1   :  { %3215 = vmatmul.mubr.msk.f32.gmra.mrb[60].mxu1 %vm76_vm4, %v2651_v37 }
 0x2c2   :  { %3217 = vmatprep.mubr.msk.f32.mxu1 %vm3480_vm3, %v3481_v5 }
 0x2c5   :  { %3218 = vmatmul.mubr.msk.f32.gmra.mrb[62].mxu1 %vm76_vm4, %v2652_v38 }
 0x2c6   :  { %3220 = vmatprep.mubr.msk.f32.mxu1 %vm3480_vm3, %v3481_v5 }
 0x2c9   :  { %3221 = vmatmul.mubr.msk.f32.gmra.mrb[64].mxu1 %vm76_vm4, %v2653_v48 }
 0x2ca   :  { %3223 = vmatprep.mubr.msk.f32.mxu1 %vm3480_vm3, %v3481_v5 }
 0x2cd   :  { %3224 = vmatmul.mubr.msk.f32.gmra.mrb[66].mxu1 %vm76_vm4, %v2654_v57 }
 0x2ce   :  { %3226 = vmatprep.mubr.msk.f32.mxu1 %vm3480_vm3, %v3481_v5 }
 0x2d1   :  { %3227 = vmatmul.mubr.msk.f32.gmra.mrb[68].mxu1 %vm76_vm4, %v2655_v29 }
 0x2d2   :  { %3229 = vmatprep.mubr.msk.f32.mxu1 %vm3480_vm3, %v3481_v5 }
 0x2d5   :  { %3230 = vmatmul.mubr.msk.f32.gmra.mrb[70].mxu1 %vm76_vm4, %v2656_v41  ;;  %v2160_v41 = vld [vmem:[%s4714_s3 + $0x8] sm:$0xff] }
 0x2d6   :  { %3232 = vmatprep.mubr.msk.f32.mxu1 %vm3480_vm3, %v3481_v5  ;;  %2322 = vmatprep.mubr.f32.mxu0 %v2160_v41 }
 0x2d9   :  { %3233 = vmatmul.mubr.msk.f32.gmra.mrb[72].mxu1 %vm76_vm4, %v2657_v42 }
 0x2da   :  { %3235 = vmatprep.mubr.msk.f32.mxu1 %vm3480_vm3, %v3481_v5 }
 0x2dd   :  { %3236 = vmatmul.mubr.msk.f32.gmra.mrb[74].mxu1 %vm76_vm4, %v2658_v44 }
 0x2de   :  { %3238 = vmatprep.mubr.msk.f32.mxu1 %vm3480_vm3, %v3481_v5 }
 0x2e1   :  { %3239 = vmatmul.mubr.msk.f32.gmra.mrb[76].mxu1 %vm76_vm4, %v2659_v45 }
 0x2e2   :  { %3241 = vmatprep.mubr.msk.f32.mxu1 %vm3480_vm3, %v3481_v5 }
 0x2e5   :  { %3242 = vmatmul.mubr.msk.f32.gmra.mrb[78].mxu1 %vm76_vm4, %v2660_v46 }
 0x2e6   :  { %3244 = vmatprep.mubr.msk.f32.mxu1 %vm3480_vm3, %v3481_v5 }
 0x2e9   :  { %3245 = vmatmul.mubr.msk.f32.gmra.mrb[80].mxu1 %vm76_vm4, %v2661_v56 }
 0x2ea   :  { %3247 = vmatprep.mubr.msk.f32.mxu1 %vm3480_vm3, %v3481_v5 }
 0x2ed   :  { %3248 = vmatmul.mubr.msk.f32.gmra.mrb[82].mxu1 %vm76_vm4, %v2662_v50 }
 0x2ee   :  { %3250 = vmatprep.mubr.msk.f32.mxu1 %vm3480_vm3, %v3481_v5 }
 0x2f1   :  { %3251 = vmatmul.mubr.msk.f32.gmra.mrb[84].mxu1 %vm76_vm4, %v2663_v40 }
 0x2f2   :  { %3253 = vmatprep.mubr.msk.f32.mxu1 %vm3480_vm3, %v3481_v5 }
 0x2f5   :  { %3254 = vmatmul.mubr.msk.f32.gmra.mrb[86].mxu1 %vm76_vm4, %v2664_v47 }
 0x2f6   :  { %3256 = vmatprep.mubr.msk.f32.mxu1 %vm3480_vm3, %v3481_v5 }
 0x2f9   :  { %3257 = vmatmul.mubr.msk.f32.gmra.mrb[88].mxu1 %vm76_vm4, %v2665_v53 }
 0x2fa   :  { %3259 = vmatprep.mubr.msk.f32.mxu1 %vm3480_vm3, %v3481_v5 }
 0x2fd   :  { %3260 = vmatmul.mubr.msk.f32.gmra.mrb[90].mxu1 %vm76_vm4, %v2666_v8 }
 0x2fe   :  { %3262 = vmatprep.mubr.msk.f32.mxu1 %vm3480_vm3, %v3481_v5 }
 0x301   :  { %3263 = vmatmul.mubr.msk.f32.gmra.mrb[92].mxu1 %vm76_vm4, %v2667_v26 }
 0x302   :  { %3265 = vmatprep.mubr.msk.f32.mxu1 %vm3480_vm3, %v3481_v5 }
 0x305   :  { %3266 = vmatmul.mubr.msk.f32.gmra.mrb[94].mxu1 %vm76_vm4, %v2668_v39 }
 0x306   :  { %3268 = vmatprep.mubr.msk.f32.mxu1 %vm3480_vm3, %v3481_v5 }
 0x309   :  { %3269 = vmatmul.mubr.msk.f32.gmra.mrb[96].mxu1 %vm76_vm4, %v2669_v59 }
 0x30a   :  { %3271 = vmatprep.mubr.msk.f32.mxu1 %vm3480_vm3, %v3481_v5 }
 0x30d   :  { %3272 = vmatmul.mubr.msk.f32.gmra.mrb[98].mxu1 %vm76_vm4, %v2670_v11 }
 0x30e   :  { %3274 = vmatprep.mubr.msk.f32.mxu1 %vm3480_vm3, %v3481_v5 }
 0x311   :  { %3275 = vmatmul.mubr.msk.f32.gmra.mrb[100].mxu1 %vm76_vm4, %v2671_v22 }
 0x312   :  { %3277 = vmatprep.mubr.msk.f32.mxu1 %vm3480_vm3, %v3481_v5 }
 0x315   :  { %3278 = vmatmul.mubr.msk.f32.gmra.mrb[102].mxu1 %vm76_vm4, %v2672_v27 }
 0x316   :  { %3280 = vmatprep.mubr.msk.f32.mxu1 %vm3480_vm3, %v3481_v5 }
 0x319   :  { %3281 = vmatmul.mubr.msk.f32.gmra.mrb[104].mxu1 %vm76_vm4, %v2673_v60 }
 0x31a   :  { %3283 = vmatprep.mubr.msk.f32.mxu1 %vm3480_vm3, %v3481_v5  ;;  %v4397_v5 = vpop.permute.xlu0 %2223 }
 0x31d   :  { %3284 = vmatmul.mubr.msk.f32.gmra.mrb[106].mxu1 %vm76_vm4, %v2674_v58 }
 0x31e   :  { %v1209_v6 = vpop.permute.xlu0 %1208 }
 0x34c   :  { %v3158_v14 = vpop.f32.mrb[24].mxu1 }
 0x34d   :  { %v1295_v15 = vadd.f32 %v3158_v14, %v1214_v1  ;;  %v1289_v7 = vpop.f32.mrb[25].mxu1 }
 0x34e   :  { %v1290_v12 = vadd.f32 %v1289_v7, %v1209_v6 }
 0x34f   :  { %v1299_v18 = vmax.f32 %v1295_v15, 0.0 }
 0x350   :  { %v1298_v24 = vmax.f32 %v1290_v12, 0.0  ;;  %v1547_v13 = vpop.f32.mrb[26].mxu1 }
 0x351   :  { %1303 = vst.msk [vmem:[%s4718_s7 + $0x8] sm:$0x3] %vm1302_vm9, %v1299_v18  ;;  %v1548_v35 = vadd.f32 %v4402_v4, %v1547_v13  ;;  %v3165_v17 = vpop.f32.mrb[27].mxu1 }
 0x352   :  { %1301 = vst.msk [vmem:[%s4718_s7] sm:$0xff] %vm1300_vm10, %v1298_v24 }
 0x353   :  { %v1751_v19 = vmax.f32 %v1548_v35, 0.0 }
 0x354   :  { %v1552_v33 = vpop.f32.mrb[28].mxu1 }
 0x355   :  { %v1553_v43 = vadd.f32 %v4402_v4, %v1552_v33  ;;  %v3168_v49 = vpop.f32.mrb[29].mxu1  ;;  %v1833_v3 = vrot.slane %v1751_v19, 1  ;;  %v1996_v36 = vrot.slane %v1751_v19, 2 }
 0x357   :  { %v1752_v0 = vmax.f32 %v1553_v43, 0.0 }
 0x358   :  { %v1557_v23 = vpop.f32.mrb[30].mxu1 }
 0x359   :  { %v1834_v16 = vrot.slane %v1752_v0, 1  ;;  %v1997_v28 = vrot.slane %v1752_v0, 2  ;;  %v1558_v34 = vadd.f32 %v4402_v4, %v1557_v23  ;;  %v3171_v25 = vpop.f32.mrb[31].mxu1 }
 0x35b   :  { %v1835_v20 = vsel %vm556_vm5, %v1833_v3, %v1834_v16  ;;  %v1998_v30 = vsel %vm720_vm6, %v1996_v36, %v1997_v28  ;;  %v1753_v21 = vmax.f32 %v1558_v34, 0.0 }
 0x35c   :  { %v1955_v10 = vmax.f32 %v1751_v19, %v1835_v20  ;;  %v1562_v31 = vpop.f32.mrb[32].mxu1 }
 0x35d   :  { %v1836_v32 = vrot.slane %v1753_v21, 1  ;;  %v1999_v51 = vrot.slane %v1753_v21, 2  ;;  %v1563_v61 = vadd.f32 %v4402_v4, %v1562_v31  ;;  %v3174_v37 = vpop.f32.mrb[33].mxu1 }
 0x35e   :  { %v4418_v38 = vmax.f32 %v1955_v10, %v1998_v30 }
 0x35f   :  { %v1837_v48 = vsel %vm556_vm5, %v1834_v16, %v1836_v32  ;;  %v2000_v57 = vsel %vm720_vm6, %v1997_v28, %v1999_v51  ;;  %v1754_v29 = vmax.f32 %v1563_v61, 0.0 }
 0x360   :  { %v1956_v42 = vmax.f32 %v1752_v0, %v1837_v48  ;;  %v1567_v44 = vpop.f32.mrb[34].mxu1 }
 0x361   :  { %v1838_v45 = vrot.slane %v1754_v29, 1  ;;  %v2001_v46 = vrot.slane %v1754_v29, 2  ;;  %v1568_v56 = vadd.f32 %v4402_v4, %v1567_v44  ;;  %v3177_v50 = vpop.f32.mrb[35].mxu1 }
 0x362   :  { %v4426_v40 = vmax.f32 %v1956_v42, %v2000_v57 }
 0x363   :  { %v1839_v47 = vsel %vm556_vm5, %v1836_v32, %v1838_v45  ;;  %v2002_v53 = vsel %vm720_vm6, %v1999_v51, %v2001_v46  ;;  %v1755_v8 = vmax.f32 %v1568_v56, 0.0 }
 0x364   :  { %v1957_v26 = vmax.f32 %v1753_v21, %v1839_v47  ;;  %v1572_v39 = vpop.f32.mrb[36].mxu1  ;;  %v3409_v59 = vpack.c.bf16 %v4426_v40, %v4418_v38 }
 0x365   :  { %v1840_v11 = vrot.slane %v1755_v8, 1  ;;  %v2003_v22 = vrot.slane %v1755_v8, 2  ;;  %v1573_v27 = vadd.f32 %v4402_v4, %v1572_v39  ;;  %v3180_v60 = vpop.f32.mrb[37].mxu1 }
 0x366   :  { %v4433_v58 = vmax.f32 %v1957_v26, %v2002_v53 }
 0x367   :  { %v1841_v1 = vsel %vm556_vm5, %v1838_v45, %v1840_v11  ;;  %v2004_v14 = vsel %vm720_vm6, %v2001_v46, %v2003_v22  ;;  %v1756_v6 = vmax.f32 %v1573_v27, 0.0 }
 0x368   :  { %v1958_v15 = vmax.f32 %v1754_v29, %v1841_v1  ;;  %v1577_v7 = vpop.f32.mrb[38].mxu1 }
 0x369   :  { %v1842_v12 = vrot.slane %v1756_v6, 1  ;;  %v2005_v18 = vrot.slane %v1756_v6, 2  ;;  %v1578_v24 = vadd.f32 %v4402_v4, %v1577_v7  ;;  %v3183_v13 = vpop.f32.mrb[39].mxu1 }
 0x36a   :  { %v4438_v35 = vmax.f32 %v1958_v15, %v2004_v14 }
 0x36b   :  { %v1843_v17 = vsel %vm556_vm5, %v1840_v11, %v1842_v12  ;;  %v2006_v19 = vsel %vm720_vm6, %v2003_v22, %v2005_v18  ;;  %v1757_v33 = vmax.f32 %v1578_v24, 0.0 }
 0x36c   :  { %v1959_v43 = vmax.f32 %v1755_v8, %v1843_v17  ;;  %v1582_v49 = vpop.f32.mrb[40].mxu1  ;;  %v3413_v0 = vpack.c.bf16 %v4438_v35, %v4433_v58 }
 0x36d   :  { %v1844_v3 = vrot.slane %v1757_v33, 1  ;;  %v2007_v23 = vrot.slane %v1757_v33, 2  ;;  %v1583_v36 = vadd.f32 %v4402_v4, %v1582_v49  ;;  %v3186_v16 = vpop.f32.mrb[41].mxu1 }
 0x36e   :  { %v4445_v28 = vmax.f32 %v1959_v43, %v2006_v19 }
 0x36f   :  { %v1845_v34 = vsel %vm556_vm5, %v1842_v12, %v1844_v3  ;;  %v2008_v25 = vsel %vm720_vm6, %v2005_v18, %v2007_v23  ;;  %v1758_v20 = vmax.f32 %v1583_v36, 0.0 }
 0x370   :  { %v1960_v30 = vmax.f32 %v1756_v6, %v1845_v34  ;;  %v1587_v21 = vpop.f32.mrb[42].mxu1 }
 0x371   :  { %v1846_v10 = vrot.slane %v1758_v20, 1  ;;  %v2009_v31 = vrot.slane %v1758_v20, 2  ;;  %v1588_v32 = vadd.f32 %v4402_v4, %v1587_v21  ;;  %v3189_v51 = vpop.f32.mrb[43].mxu1 }
 0x372   :  { %v4450_v61 = vmax.f32 %v1960_v30, %v2008_v25 }
 0x373   :  { %v1847_v37 = vsel %vm556_vm5, %v1844_v3, %v1846_v10  ;;  %v2010_v48 = vsel %vm720_vm6, %v2007_v23, %v2009_v31  ;;  %v1759_v57 = vmax.f32 %v1588_v32, 0.0 }
 0x374   :  { %v1961_v29 = vmax.f32 %v1757_v33, %v1847_v37  ;;  %v1592_v41 = vpop.f32.mrb[44].mxu1  ;;  %v3417_v42 = vpack.c.bf16 %v4450_v61, %v4445_v28 }
 0x375   :  { %v1848_v44 = vrot.slane %v1759_v57, 1  ;;  %v2011_v45 = vrot.slane %v1759_v57, 2  ;;  %v1593_v46 = vadd.f32 %v4402_v4, %v1592_v41  ;;  %v3192_v56 = vpop.f32.mrb[45].mxu1 }
 0x376   :  { %v4457_v50 = vmax.f32 %v1961_v29, %v2010_v48 }
 0x377   :  { %v1849_v47 = vsel %vm556_vm5, %v1846_v10, %v1848_v44  ;;  %v2012_v53 = vsel %vm720_vm6, %v2009_v31, %v2011_v45  ;;  %v1760_v8 = vmax.f32 %v1593_v46, 0.0 }
 0x378   :  { %v1962_v26 = vmax.f32 %v1758_v20, %v1849_v47  ;;  %v1597_v39 = vpop.f32.mrb[46].mxu1 }
 0x379   :  { %v1850_v11 = vrot.slane %v1760_v8, 1  ;;  %v2013_v22 = vrot.slane %v1760_v8, 2  ;;  %v1598_v27 = vadd.f32 %v4402_v4, %v1597_v39  ;;  %v3195_v60 = vpop.f32.mrb[47].mxu1 }
 0x37a   :  { %v4462_v1 = vmax.f32 %v1962_v26, %v2012_v53 }
 0x37b   :  { %v1851_v14 = vsel %vm556_vm5, %v1848_v44, %v1850_v11  ;;  %v2014_v6 = vsel %vm720_vm6, %v2011_v45, %v2013_v22  ;;  %v1761_v15 = vmax.f32 %v1598_v27, 0.0 }
 0x37c   :  { %v1963_v7 = vmax.f32 %v1759_v57, %v1851_v14  ;;  %v1602_v12 = vpop.f32.mrb[48].mxu1  ;;  %v3421_v18 = vpack.c.bf16 %v4462_v1, %v4457_v50 }
 0x37d   :  { %v1852_v24 = vrot.slane %v1761_v15, 1  ;;  %v2015_v13 = vrot.slane %v1761_v15, 2  ;;  %v1603_v17 = vadd.f32 %v4402_v4, %v1602_v12  ;;  %v3198_v19 = vpop.f32.mrb[49].mxu1 }
 0x37e   :  { %v4469_v33 = vmax.f32 %v1963_v7, %v2014_v6 }
 0x37f   :  { %v1853_v43 = vsel %vm556_vm5, %v1850_v11, %v1852_v24  ;;  %v2016_v49 = vsel %vm720_vm6, %v2013_v22, %v2015_v13  ;;  %v1762_v3 = vmax.f32 %v1603_v17, 0.0 }
 0x380   :  { %v1964_v23 = vmax.f32 %v1760_v8, %v1853_v43  ;;  %v1607_v36 = vpop.f32.mrb[50].mxu1 }
 0x381   :  { %v1854_v16 = vrot.slane %v1762_v3, 1  ;;  %v2017_v34 = vrot.slane %v1762_v3, 2  ;;  %v1608_v25 = vadd.f32 %v4402_v4, %v1607_v36  ;;  %v3201_v20 = vpop.f32.mrb[51].mxu1 }
 0x382   :  { %v4474_v30 = vmax.f32 %v1964_v23, %v2016_v49 }
 0x383   :  { %v1855_v21 = vsel %vm556_vm5, %v1852_v24, %v1854_v16  ;;  %v2018_v10 = vsel %vm720_vm6, %v2015_v13, %v2017_v34  ;;  %v1763_v31 = vmax.f32 %v1608_v25, 0.0 }
 0x384   :  { %v1965_v32 = vmax.f32 %v1761_v15, %v1855_v21  ;;  %v1612_v51 = vpop.f32.mrb[52].mxu1  ;;  %v3425_v37 = vpack.c.bf16 %v4474_v30, %v4469_v33 }
 0x385   :  { %v1856_v48 = vrot.slane %v1763_v31, 1  ;;  %v2019_v57 = vrot.slane %v1763_v31, 2  ;;  %v1613_v29 = vadd.f32 %v4402_v4, %v1612_v51  ;;  %v3204_v41 = vpop.f32.mrb[53].mxu1 }
 0x386   :  { %v4481_v44 = vmax.f32 %v1965_v32, %v2018_v10 }
 0x387   :  { %v1857_v45 = vsel %vm556_vm5, %v1854_v16, %v1856_v48  ;;  %v2020_v46 = vsel %vm720_vm6, %v2017_v34, %v2019_v57  ;;  %v1764_v56 = vmax.f32 %v1613_v29, 0.0 }
 0x388   :  { %v1966_v47 = vmax.f32 %v1762_v3, %v1857_v45  ;;  %v1617_v53 = vpop.f32.mrb[54].mxu1 }
 0x389   :  { %v1858_v8 = vrot.slane %v1764_v56, 1  ;;  %v2021_v26 = vrot.slane %v1764_v56, 2  ;;  %v1618_v39 = vadd.f32 %v4402_v4, %v1617_v53  ;;  %v3207_v11 = vpop.f32.mrb[55].mxu1 }
 0x38a   :  { %v4486_v22 = vmax.f32 %v1966_v47, %v2020_v46 }
 0x38b   :  { %v1859_v27 = vsel %vm556_vm5, %v1856_v48, %v1858_v8  ;;  %v2022_v60 = vsel %vm720_vm6, %v2019_v57, %v2021_v26  ;;  %v1765_v14 = vmax.f32 %v1618_v39, 0.0 }
 0x38c   :  { %v1967_v6 = vmax.f32 %v1763_v31, %v1859_v27  ;;  %v1622_v15 = vpop.f32.mrb[56].mxu1  ;;  %v3429_v7 = vpack.c.bf16 %v4486_v22, %v4481_v44 }
 0x38d   :  { %v1860_v12 = vrot.slane %v1765_v14, 1  ;;  %v2023_v24 = vrot.slane %v1765_v14, 2  ;;  %v1623_v13 = vadd.f32 %v4402_v4, %v1622_v15  ;;  %v3210_v17 = vpop.f32.mrb[57].mxu1 }
 0x38e   :  { %v4493_v19 = vmax.f32 %v1967_v6, %v2022_v60 }
 0x38f   :  { %v1861_v43 = vsel %vm556_vm5, %v1858_v8, %v1860_v12  ;;  %v2024_v49 = vsel %vm720_vm6, %v2021_v26, %v2023_v24  ;;  %v1766_v3 = vmax.f32 %v1623_v13, 0.0 }
 0x390   :  { %v1968_v23 = vmax.f32 %v1764_v56, %v1861_v43  ;;  %v1627_v36 = vpop.f32.mrb[58].mxu1 }
 0x391   :  { %v1862_v16 = vrot.slane %v1766_v3, 1  ;;  %v2025_v34 = vrot.slane %v1766_v3, 2  ;;  %v1628_v25 = vadd.f32 %v4402_v4, %v1627_v36  ;;  %v3213_v20 = vpop.f32.mrb[59].mxu1 }
 0x392   :  { %v4498_v21 = vmax.f32 %v1968_v23, %v2024_v49 }
 0x393   :  { %v1863_v10 = vsel %vm556_vm5, %v1860_v12, %v1862_v16  ;;  %v2026_v31 = vsel %vm720_vm6, %v2023_v24, %v2025_v34  ;;  %v1767_v32 = vmax.f32 %v1628_v25, 0.0 }
 0x394   :  { %v1969_v51 = vmax.f32 %v1765_v14, %v1863_v10  ;;  %v1632_v48 = vpop.f32.mrb[60].mxu1  ;;  %v3433_v57 = vpack.c.bf16 %v4498_v21, %v4493_v19 }
 0x395   :  { %v1864_v29 = vrot.slane %v1767_v32, 1  ;;  %v2027_v41 = vrot.slane %v1767_v32, 2  ;;  %v1633_v45 = vadd.f32 %v4402_v4, %v1632_v48  ;;  %v3216_v46 = vpop.f32.mrb[61].mxu1 }
 0x396   :  { %v4505_v56 = vmax.f32 %v1969_v51, %v2026_v31 }
 0x397   :  { %v1865_v47 = vsel %vm556_vm5, %v1862_v16, %v1864_v29  ;;  %v2028_v53 = vsel %vm720_vm6, %v2025_v34, %v2027_v41  ;;  %v1768_v8 = vmax.f32 %v1633_v45, 0.0 }
 0x398   :  { %v1970_v26 = vmax.f32 %v1766_v3, %v1865_v47  ;;  %v1637_v39 = vpop.f32.mrb[62].mxu1 }
 0x399   :  { %v1866_v11 = vrot.slane %v1768_v8, 1  ;;  %v2029_v27 = vrot.slane %v1768_v8, 2  ;;  %v1638_v60 = vadd.f32 %v4402_v4, %v1637_v39  ;;  %v3219_v14 = vpop.f32.mrb[63].mxu1 }
 0x39a   :  { %v4510_v6 = vmax.f32 %v1970_v26, %v2028_v53 }
 0x39b   :  { %v1769_v15 = vmax.f32 %v1638_v60, 0.0  ;;  %v1867_v12 = vsel %vm556_vm5, %v1864_v29, %v1866_v11  ;;  %v2030_v24 = vsel %vm720_vm6, %v2027_v41, %v2029_v27 }
 0x39c   :  { %v1642_v13 = vpop.f32.mrb[64].mxu1  ;;  %v1971_v17 = vmax.f32 %v1767_v32, %v1867_v12  ;;  %v3437_v43 = vpack.c.bf16 %v4510_v6, %v4505_v56 }
 0x39d   :  { %v1868_v49 = vrot.slane %v1769_v15, 1  ;;  %v2031_v3 = vrot.slane %v1769_v15, 2  ;;  %v1643_v23 = vadd.f32 %v4402_v4, %v1642_v13  ;;  %v3222_v36 = vpop.f32.mrb[65].mxu1 }
 0x39e   :  { %v2134_v16 = vmax.f32 %v1971_v17, %v2030_v24 }
 0x39f   :  { %v1770_v34 = vmax.f32 %v1643_v23, 0.0  ;;  %v1869_v25 = vsel %vm556_vm5, %v1866_v11, %v1868_v49  ;;  %v2032_v20 = vsel %vm720_vm6, %v2029_v27, %v2031_v3 }
 0x3a0   :  { %v1647_v10 = vpop.f32.mrb[66].mxu1  ;;  %v1972_v31 = vmax.f32 %v1768_v8, %v1869_v25 }
 0x3a1   :  { %v1870_v51 = vrot.slane %v1770_v34, 1  ;;  %v2033_v48 = vrot.slane %v1770_v34, 2  ;;  %v1648_v32 = vadd.f32 %v4402_v4, %v1647_v10  ;;  %v3225_v29 = vpop.f32.mrb[67].mxu1 }
 0x3a2   :  { %v2135_v41 = vmax.f32 %v1972_v31, %v2032_v20 }
 0x3a3   :  { %v1771_v45 = vmax.f32 %v1648_v32, 0.0  ;;  %v1871_v46 = vsel %vm556_vm5, %v1868_v49, %v1870_v51  ;;  %v2034_v47 = vsel %vm720_vm6, %v2031_v3, %v2033_v48 }
 0x3a4   :  { %v1652_v53 = vpop.f32.mrb[68].mxu1  ;;  %v3407_v26 = vpack.c.bf16 %v2135_v41, %v2134_v16  ;;  %v1973_v39 = vmax.f32 %v1769_v15, %v1871_v46 }
 0x3a5   :  { %v1872_v60 = vrot.slane %v1771_v45, 1  ;;  %v2035_v11 = vrot.slane %v1771_v45, 2  ;;  %v1653_v27 = vadd.f32 %v4402_v4, %v1652_v53  ;;  %v3228_v14 = vpop.f32.mrb[69].mxu1 }
 0x3a6   :  { %3408 = vmatprep.subr.bf16.mxu0 %v3407_v26  ;;  %v2136_v8 = vmax.f32 %v1973_v39, %v2034_v47 }
 0x3a7   :  { %v1772_v12 = vmax.f32 %v1653_v27, 0.0  ;;  %3410 = vmatpush3.bf16.msra.mxu0 %v3409_v59  ;;  %v1873_v24 = vsel %vm556_vm5, %v1870_v51, %v1872_v60  ;;  %v2036_v13 = vsel %vm720_vm6, %v2033_v48, %v2035_v11 }
 0x3a8   :  { %v1657_v17 = vpop.f32.mrb[70].mxu1  ;;  %v1974_v49 = vmax.f32 %v1770_v34, %v1873_v24 }
 0x3a9   :  { %v1874_v3 = vrot.slane %v1772_v12, 1  ;;  %v2037_v15 = vrot.slane %v1772_v12, 2  ;;  %v1658_v23 = vadd.f32 %v4402_v4, %v1657_v17  ;;  %v3231_v36 = vpop.f32.mrb[71].mxu1 }
 0x3aa   :  { %v2137_v16 = vmax.f32 %v1974_v49, %v2036_v13 }
 0x3ab   :  { %v1773_v25 = vmax.f32 %v1658_v23, 0.0  ;;  %v1875_v20 = vsel %vm556_vm5, %v1872_v60, %v1874_v3  ;;  %v2038_v10 = vsel %vm720_vm6, %v2035_v11, %v2037_v15 }
 0x3ac   :  { %v1662_v31 = vpop.f32.mrb[72].mxu1  ;;  %v3411_v38 = vpack.c.bf16 %v2137_v16, %v2136_v8  ;;  %v1975_v40 = vmax.f32 %v1771_v45, %v1875_v20 }
 0x3ad   :  { %v1876_v59 = vrot.slane %v1773_v25, 1  ;;  %v2039_v51 = vrot.slane %v1773_v25, 2  ;;  %v1663_v48 = vadd.f32 %v4402_v4, %v1662_v31  ;;  %v3234_v32 = vpop.f32.mrb[73].mxu1 }
 0x3ae   :  { %3412 = vmatprep.subr.bf16.mxu0 %v3411_v38  ;;  %v2138_v34 = vmax.f32 %v1975_v40, %v2038_v10 }
 0x3af   :  { %v1774_v29 = vmax.f32 %v1663_v48, 0.0  ;;  %3414 = vmatpush3.bf16.msra.mxu0 %v3413_v0  ;;  %v1877_v41 = vsel %vm556_vm5, %v1874_v3, %v1876_v59  ;;  %v2040_v46 = vsel %vm720_vm6, %v2037_v15, %v2039_v51 }
 0x3b0   :  { %v1667_v47 = vpop.f32.mrb[74].mxu1  ;;  %v1976_v53 = vmax.f32 %v1772_v12, %v1877_v41 }
 0x3b1   :  { %v1878_v26 = vrot.slane %v1774_v29, 1  ;;  %v2041_v45 = vrot.slane %v1774_v29, 2  ;;  %v1668_v39 = vadd.f32 %v4402_v4, %v1667_v47  ;;  %v3237_v60 = vpop.f32.mrb[75].mxu1 }
 0x3b2   :  { %v2139_v11 = vmax.f32 %v1976_v53, %v2040_v46 }
 0x3b3   :  { %v1775_v27 = vmax.f32 %v1668_v39, 0.0  ;;  %v1879_v14 = vsel %vm556_vm5, %v1876_v59, %v1878_v26  ;;  %v2042_v8 = vsel %vm720_vm6, %v2039_v51, %v2041_v45 }
 0x3b4   :  { %v1672_v24 = vpop.f32.mrb[76].mxu1  ;;  %v3415_v58 = vpack.c.bf16 %v2139_v11, %v2138_v34  ;;  %v1977_v35 = vmax.f32 %v1773_v25, %v1879_v14 }
 0x3b5   :  { %v1880_v0 = vrot.slane %v1775_v27, 1  ;;  %v2043_v13 = vrot.slane %v1775_v27, 2  ;;  %v1673_v17 = vadd.f32 %v4402_v4, %v1672_v24  ;;  %v3240_v49 = vpop.f32.mrb[77].mxu1 }
 0x3b6   :  { %3416 = vmatprep.subr.bf16.mxu0 %v3415_v58  ;;  %v2140_v12 = vmax.f32 %v1977_v35, %v2042_v8 }
 0x3b7   :  { %v1776_v3 = vmax.f32 %v1673_v17, 0.0  ;;  %3418 = vmatpush3.bf16.msra.mxu0 %v3417_v42  ;;  %v1881_v15 = vsel %vm556_vm5, %v1878_v26, %v1880_v0  ;;  %v2044_v23 = vsel %vm720_vm6, %v2041_v45, %v2043_v13 }
 0x3b8   :  { %v1677_v36 = vpop.f32.mrb[78].mxu1  ;;  %v1978_v16 = vmax.f32 %v1774_v29, %v1881_v15 }
 0x3b9   :  { %v1882_v20 = vrot.slane %v1776_v3, 1  ;;  %v2045_v25 = vrot.slane %v1776_v3, 2  ;;  %v1678_v10 = vadd.f32 %v4402_v4, %v1677_v36  ;;  %v3243_v31 = vpop.f32.mrb[79].mxu1 }
 0x3ba   :  { %v2141_v38 = vmax.f32 %v1978_v16, %v2044_v23 }
 0x3bb   :  { %v1777_v40 = vmax.f32 %v1678_v10, 0.0  ;;  %v1883_v59 = vsel %vm556_vm5, %v1880_v0, %v1882_v20  ;;  %v2046_v51 = vsel %vm720_vm6, %v2043_v13, %v2045_v25 }
 0x3bc   :  { %v1682_v48 = vpop.f32.mrb[80].mxu1  ;;  %v3419_v28 = vpack.c.bf16 %v2141_v38, %v2140_v12  ;;  %v1979_v61 = vmax.f32 %v1775_v27, %v1883_v59 }
 0x3bd   :  { %v1884_v42 = vrot.slane %v1777_v40, 1  ;;  %v2047_v32 = vrot.slane %v1777_v40, 2  ;;  %v1683_v34 = vadd.f32 %v4402_v4, %v1682_v48  ;;  %v3246_v41 = vpop.f32.mrb[81].mxu1 }
 0x3be   :  { %3420 = vmatprep.subr.bf16.mxu0 %v3419_v28  ;;  %v2142_v29 = vmax.f32 %v1979_v61, %v2046_v51 }
 0x3bf   :  { %v1778_v46 = vmax.f32 %v1683_v34, 0.0  ;;  %3422 = vmatpush3.bf16.msra.mxu0 %v3421_v18  ;;  %v1885_v47 = vsel %vm556_vm5, %v1882_v20, %v1884_v42  ;;  %v2048_v53 = vsel %vm720_vm6, %v2045_v25, %v2047_v32 }
 0x3c0   :  { %v1687_v26 = vpop.f32.mrb[82].mxu1  ;;  %v1980_v45 = vmax.f32 %v1776_v3, %v1885_v47 }
 0x3c1   :  { %v1886_v39 = vrot.slane %v1778_v46, 1  ;;  %v2049_v60 = vrot.slane %v1778_v46, 2  ;;  %v1688_v11 = vadd.f32 %v4402_v4, %v1687_v26  ;;  %v3249_v27 = vpop.f32.mrb[83].mxu1 }
 0x3c2   :  { %v2143_v14 = vmax.f32 %v1980_v45, %v2048_v53 }
 0x3c3   :  { %v1779_v8 = vmax.f32 %v1688_v11, 0.0  ;;  %v1887_v24 = vsel %vm556_vm5, %v1884_v42, %v1886_v39  ;;  %v2050_v58 = vsel %vm720_vm6, %v2047_v32, %v2049_v60 }
 0x3c4   :  { %v1692_v35 = vpop.f32.mrb[84].mxu1  ;;  %v3423_v50 = vpack.c.bf16 %v2143_v14, %v2142_v29  ;;  %v1981_v1 = vmax.f32 %v1777_v40, %v1887_v24 }
 0x3c5   :  { %v1888_v18 = vrot.slane %v1779_v8, 1  ;;  %v2051_v0 = vrot.slane %v1779_v8, 2  ;;  %v1693_v13 = vadd.f32 %v4402_v4, %v1692_v35  ;;  %v3252_v17 = vpop.f32.mrb[85].mxu1 }
 0x3c6   :  { %3424 = vmatprep.subr.bf16.mxu0 %v3423_v50  ;;  %v2144_v49 = vmax.f32 %v1981_v1, %v2050_v58 }
 0x3c7   :  { %v1780_v12 = vmax.f32 %v1693_v13, 0.0  ;;  %3426 = vmatpush3.bf16.msra.mxu0 %v3425_v37  ;;  %v1889_v3 = vsel %vm556_vm5, %v1886_v39, %v1888_v18  ;;  %v2052_v15 = vsel %vm720_vm6, %v2049_v60, %v2051_v0 }
 0x3c8   :  { %v1697_v23 = vpop.f32.mrb[86].mxu1  ;;  %v1982_v36 = vmax.f32 %v1778_v46, %v1889_v3 }
 0x3c9   :  { %v1890_v16 = vrot.slane %v1780_v12, 1  ;;  %v2053_v20 = vrot.slane %v1780_v12, 2  ;;  %v1698_v25 = vadd.f32 %v4402_v4, %v1697_v23  ;;  %v3255_v10 = vpop.f32.mrb[87].mxu1 }
 0x3ca   :  { %v2145_v31 = vmax.f32 %v1982_v36, %v2052_v15 }
 0x3cb   :  { %v1781_v38 = vmax.f32 %v1698_v25, 0.0  ;;  %v1891_v40 = vsel %vm556_vm5, %v1888_v18, %v1890_v16  ;;  %v2054_v59 = vsel %vm720_vm6, %v2051_v0, %v2053_v20 }
 0x3cc   :  { %v1702_v51 = vpop.f32.mrb[88].mxu1  ;;  %v3427_v33 = vpack.c.bf16 %v2145_v31, %v2144_v49  ;;  %v1983_v30 = vmax.f32 %v1779_v8, %v1891_v40  ;;  %v2159_v40 = vld [vmem:[%s4714_s3] sm:$0xff] }
 0x3cd   :  { %v1892_v37 = vrot.slane %v1781_v38, 1  ;;  %v2055_v48 = vrot.slane %v1781_v38, 2  ;;  %v1703_v28 = vadd.f32 %v4402_v4, %v1702_v51  ;;  %v3258_v61 = vpop.f32.mrb[89].mxu1 }
 0x3ce   :  { %3428 = vmatprep.subr.bf16.mxu0 %v3427_v33  ;;  %v2146_v42 = vmax.f32 %v1983_v30, %v2054_v59  ;;  %v2163_v30 = vld [vmem:[%s4714_s3 + $0x20] sm:$0xff] }
 0x3cf   :  { %v1782_v32 = vmax.f32 %v1703_v28, 0.0  ;;  %3430 = vmatpush3.bf16.msra.mxu0 %v3429_v7  ;;  %v1893_v34 = vsel %vm556_vm5, %v1890_v16, %v1892_v37  ;;  %v2056_v41 = vsel %vm720_vm6, %v2053_v20, %v2055_v48 }
 0x3d0   :  { %v1707_v29 = vpop.f32.mrb[90].mxu1  ;;  %v1984_v46 = vmax.f32 %v1780_v12, %v1893_v34 }
 0x3d1   :  { %v1894_v47 = vrot.slane %v1782_v32, 1  ;;  %v2057_v53 = vrot.slane %v1782_v32, 2  ;;  %v1708_v26 = vadd.f32 %v4402_v4, %v1707_v29  ;;  %v3261_v45 = vpop.f32.mrb[91].mxu1  ;;  %v2166_v29 = vld [vmem:[%s4714_s3 + $0x38] sm:$0xff] }
 0x3d2   :  { %v2147_v39 = vmax.f32 %v1984_v46, %v2056_v41 }
 0x3d3   :  { %v1783_v60 = vmax.f32 %v1708_v26, 0.0  ;;  %v1895_v11 = vsel %vm556_vm5, %v1892_v37, %v1894_v47  ;;  %v2058_v27 = vsel %vm720_vm6, %v2055_v48, %v2057_v53 }
 0x3d4   :  { %v3431_v14 = vpack.c.bf16 %v2147_v39, %v2146_v42  ;;  %v1985_v44 = vmax.f32 %v1781_v38, %v1895_v11  ;;  %v1712_v22 = vpop.f32.mrb[92].mxu1  ;;  %v2162_v42 = vld [vmem:[%s4714_s3 + $0x18] sm:$0xff] }
 0x3d5   :  { %v1896_v7 = vrot.slane %v1783_v60, 1  ;;  %v2059_v8 = vrot.slane %v1783_v60, 2  ;;  %v1713_v24 = vadd.f32 %v4402_v4, %v1712_v22  ;;  %v3264_v58 = vpop.f32.mrb[93].mxu1 }
 0x3d6   :  { %3432 = vmatprep.subr.bf16.mxu0 %v3431_v14  ;;  %v2148_v35 = vmax.f32 %v1985_v44, %v2058_v27  ;;  %v2165_v14 = vld [vmem:[%s4714_s3 + $0x30] sm:$0xff] }
 0x3d7   :  { %3434 = vmatpush3.bf16.msra.mxu0 %v3433_v57  ;;  %v1897_v50 = vsel %vm556_vm5, %v1894_v47, %v1896_v7  ;;  %v2060_v1 = vsel %vm720_vm6, %v2057_v53, %v2059_v8  ;;  %v1784_v18 = vmax.f32 %v1713_v24, 0.0 }
 0x3d8   :  { %v1986_v0 = vmax.f32 %v1782_v32, %v1897_v50  ;;  %v1717_v13 = vpop.f32.mrb[94].mxu1 }
 0x3d9   :  { %v1898_v17 = vrot.slane %v1784_v18, 1  ;;  %v2061_v49 = vrot.slane %v1784_v18, 2  ;;  %v1718_v12 = vadd.f32 %v4402_v4, %v1717_v13  ;;  %v3267_v3 = vpop.f32.mrb[95].mxu1  ;;  %v2168_v13 = vld [vmem:[%s4714_s3 + $0x48] sm:$0xff] }
 0x3da   :  { %v2149_v15 = vmax.f32 %v1986_v0, %v2060_v1  ;;  %v2172_v3 = vld [vmem:[%s4714_s3 + $0x68] sm:$0xff] }
 0x3db   :  { %v1785_v23 = vmax.f32 %v1718_v12, 0.0  ;;  %v1899_v36 = vsel %vm556_vm5, %v1896_v7, %v1898_v17  ;;  %v2062_v16 = vsel %vm720_vm6, %v2059_v8, %v2061_v49  ;;  %v2169_v8 = vld [vmem:[%s4714_s3 + $0x50] sm:$0xff] }
 0x3dc   :  { %v3435_v19 = vpack.c.bf16 %v2149_v15, %v2148_v35  ;;  %v1722_v21 = vpop.f32.mrb[96].mxu1  ;;  %v1987_v57 = vmax.f32 %v1783_v60, %v1899_v36 }
 0x3dd   :  { %v1900_v20 = vrot.slane %v1785_v23, 1  ;;  %v2063_v25 = vrot.slane %v1785_v23, 2  ;;  %v1723_v10 = vadd.f32 %v4402_v4, %v1722_v21  ;;  %v3270_v31 = vpop.f32.mrb[97].mxu1 }
 0x3de   :  { %3436 = vmatprep.subr.bf16.mxu0 %v3435_v19  ;;  %v2150_v38 = vmax.f32 %v1987_v57, %v2062_v16 }
 0x3df   :  { %3438 = vmatpush3.bf16.msra.mxu0 %v3437_v43  ;;  %v1786_v59 = vmax.f32 %v1723_v10, 0.0  ;;  %v1901_v51 = vsel %vm556_vm5, %v1898_v17, %v1900_v20  ;;  %v2064_v33 = vsel %vm720_vm6, %v2061_v49, %v2063_v25 }
 0x3e0   :  { %v1727_v37 = vpop.f32.mrb[98].mxu1  ;;  %v1988_v48 = vmax.f32 %v1784_v18, %v1901_v51 }
 0x3e1   :  { %v1902_v28 = vrot.slane %v1786_v59, 1  ;;  %v2065_v61 = vrot.slane %v1786_v59, 2  ;;  %v1728_v56 = vadd.f32 %v4402_v4, %v1727_v37  ;;  %v3273_v6 = vpop.f32.mrb[99].mxu1 }
 0x3e2   :  { %2323 = vmatmul.mubr.f32.vlgmr.msra.gmra.mrb[82].mxu0 %v2159_v40  ;;  %v2151_v43 = vmax.f32 %v1988_v48, %v2064_v33  ;;  %v2175_v40 = vld [vmem:[%s4714_s3 + $0x80] sm:$0xff] }
 0x3e3   :  { %2327 = vmatprep.mubr.f32.mxu0 %v2163_v30  ;;  %v1787_v32 = vmax.f32 %v1728_v56, 0.0  ;;  %v1903_v34 = vsel %vm556_vm5, %v1900_v20, %v1902_v28  ;;  %v2066_v41 = vsel %vm720_vm6, %v2063_v25, %v2065_v61  ;;  %v2171_v25 = vld [vmem:[%s4714_s3 + $0x60] sm:$0xff] }
 0x3e4   :  { %v1732_v46 = vpop.f32.mrb[100].mxu1  ;;  %v3439_v47 = vpack.c.bf16 %v2151_v43, %v2150_v38  ;;  %v1989_v53 = vmax.f32 %v1785_v23, %v1903_v34  ;;  %v2178_v43 = vld [vmem:[%s4714_s3 + $0x98] sm:$0xff] }
 0x3e5   :  { %v1904_v26 = vrot.slane %v1787_v32, 1  ;;  %v2067_v45 = vrot.slane %v1787_v32, 2  ;;  %v1733_v39 = vadd.f32 %v4402_v4, %v1732_v46  ;;  %v3276_v60 = vpop.f32.mrb[101].mxu1 }
 0x3e6   :  { %2328 = vmatmul.mubr.f32.gmra.mrb[84].mxu0 %v2162_v42  ;;  %3440 = vmatprep.subr.bf16.mxu0 %v3439_v47  ;;  %v2152_v11 = vmax.f32 %v1989_v53, %v2066_v41  ;;  %v2181_v53 = vld [vmem:[%s4714_s3 + $0xb0] sm:$0xff]  ;;  %v2180_v60 = vld [vmem:[%s4714_s3 + $0xa8] sm:$0xff] }
 0x3e7   :  { %2332 = vmatprep.mubr.f32.mxu0 %v2166_v29  ;;  %v1788_v27 = vmax.f32 %v1733_v39, 0.0  ;;  %3442 = vmatpush3.bf16.msra.mxu0 %v3439_v47  ;;  %v1905_v44 = vsel %vm556_vm5, %v1902_v28, %v1904_v26  ;;  %v2068_v22 = vsel %vm720_vm6, %v2065_v61, %v2067_v45  ;;  %v2174_v61 = vld [vmem:[%s4714_s3 + $0x78] sm:$0xff]  ;;  %v2177_v29 = vld [vmem:[%s4714_s3 + $0x90] sm:$0xff] }
 0x3e8   :  { %v1737_v7 = vpop.f32.mrb[102].mxu1  ;;  %v1990_v24 = vmax.f32 %v1786_v59, %v1905_v44  ;;  %v2164_v44 = vld [vmem:[%s4714_s3 + $0x28] sm:$0xff] }
 0x3e9   :  { %v1906_v58 = vrot.slane %v1788_v27, 1  ;;  %v2069_v35 = vrot.slane %v1788_v27, 2  ;;  %v1738_v50 = vadd.f32 %v4402_v4, %v1737_v7  ;;  %v3279_v1 = vpop.f32.mrb[103].mxu1  ;;  %v2170_v7 = vld [vmem:[%s4714_s3 + $0x58] sm:$0xff] }
 0x3ea   :  { %2333 = vmatmul.mubr.f32.gmra.mrb[86].mxu0 %v2165_v14  ;;  %v2153_v18 = vmax.f32 %v1990_v24, %v2068_v22  ;;  %v2167_v22 = vld [vmem:[%s4714_s3 + $0x40] sm:$0xff]  ;;  %v2176_v24 = vld [vmem:[%s4714_s3 + $0x88] sm:$0xff] }
 0x3eb   :  { %v1789_v0 = vmax.f32 %v1738_v50, 0.0  ;;  %2337 = vmatprep.mubr.f32.mxu0 %v2169_v8  ;;  %v1907_v17 = vsel %vm556_vm5, %v1904_v26, %v1906_v58  ;;  %v2070_v49 = vsel %vm720_vm6, %v2067_v45, %v2069_v35  ;;  %v2173_v8 = vld [vmem:[%s4714_s3 + $0x70] sm:$0xff]  ;;  %v2476_v50 = vld [vmem:[%s4717_s5] sm:$0xff] }
 0x3ec   :  { %v1742_v12 = vpop.f32.mrb[104].mxu1  ;;  %v3443_v15 = vpack.c.bf16 %v2153_v18, %v2152_v11  ;;  %v1991_v23 = vmax.f32 %v1787_v32, %v1907_v17 }
 0x3ed   :  { %v1908_v36 = vrot.slane %v1789_v0, 1  ;;  %v2071_v16 = vrot.slane %v1789_v0, 2  ;;  %v1743_v19 = vadd.f32 %v4402_v4, %v1742_v12  ;;  %v3282_v21 = vpop.f32.mrb[105].mxu1 }
 0x3ee   :  { %2338 = vmatmul.mubr.f32.gmra.mrb[88].mxu0 %v2168_v13  ;;  %3444 = vmatprep.subr.bf16.mxu0 %v3443_v15  ;;  %v2154_v57 = vmax.f32 %v1991_v23, %v2070_v49 }
 0x3ef   :  { %v1790_v20 = vmax.f32 %v1743_v19, 0.0  ;;  %2342 = vmatprep.mubr.f32.mxu0 %v2172_v3  ;;  %3446 = vmatpush3.bf16.msra.mxu0 %v3443_v15  ;;  %v1909_v10 = vsel %vm556_vm5, %v1906_v58, %v1908_v36  ;;  %v2072_v31 = vsel %vm720_vm6, %v2069_v35, %v2071_v16  ;;  %v2179_v58 = vld [vmem:[%s4714_s3 + $0xa0] sm:$0xff]  ;;  %v2182_v35 = vld [vmem:[%s4714_s3 + $0xb8] sm:$0xff] }
 0x3f0   :  { %v1747_v38 = vpop.f32.mrb[106].mxu1  ;;  %v1992_v59 = vmax.f32 %v1788_v27, %v1909_v10  ;;  %v2161_v27 = vld [vmem:[%s4714_s3 + $0x10] sm:$0xff] }
 0x3f1   :  { %v1910_v51 = vrot.slane %v1790_v20, 1  ;;  %v2073_v33 = vrot.slane %v1790_v20, 2  ;;  %v1748_v30 = vadd.f32 %v4402_v4, %v1747_v38  ;;  %v3285_v37 = vpop.f32.mrb[107].mxu1 }
 0x3f2   :  { %2343 = vmatmul.mubr.f32.gmra.mrb[90].mxu0 %v2171_v25  ;;  %v2155_v48 = vmax.f32 %v1992_v59, %v2072_v31 }
 0x3f3   :  { %v1791_v28 = vmax.f32 %v1748_v30, 0.0  ;;  %2347 = vmatprep.mubr.f32.mxu0 %v2175_v40  ;;  %v1911_v56 = vsel %vm556_vm5, %v1908_v36, %v1910_v51  ;;  %v2074_v6 = vsel %vm720_vm6, %v2071_v16, %v2073_v33 }
 0x3f4   :  { %v3447_v42 = vpack.c.bf16 %v2155_v48, %v2154_v57  ;;  %v1993_v32 = vmax.f32 %v1789_v0, %v1911_v56 }
 0x3f5   :  { %v1912_v4 = vrot.slane %v1791_v28, 1  ;;  %v2075_v34 = vrot.slane %v1791_v28, 2 }
 0x3f6   :  { %2348 = vmatmul.mubr.f32.gmra.mrb[92].mxu0 %v2174_v61  ;;  %3448 = vmatprep.subr.bf16.mxu0 %v3447_v42  ;;  %v2156_v41 = vmax.f32 %v1993_v32, %v2074_v6 }
 0x3f7   :  { %2352 = vmatprep.mubr.f32.mxu0 %v2178_v43  ;;  %3450 = vmatpush3.bf16.msra.mxu0 %v3447_v42  ;;  %v1913_v46 = vsel %vm556_vm5, %v1910_v51, %v1912_v4  ;;  %v2076_v47 = vsel %vm720_vm6, %v2073_v33, %v2075_v34  ;;  %v1995_v45 = vmax.f32 %v1791_v28, %v1912_v4 }
 0x3f8   :  { %v1994_v26 = vmax.f32 %v1790_v20, %v1913_v46 }
 0x3f9   :  { %v2158_v14 = vmax.f32 %v1995_v45, %v2075_v34 }
 0x3fa   :  { %2353 = vmatmul.mubr.f32.gmra.mrb[94].mxu0 %v2177_v29  ;;  %v2157_v39 = vmax.f32 %v1994_v26, %v2076_v47 }
 0x3fb   :  { %2357 = vmatprep.mubr.f32.mxu0 %v2181_v53 }
 0x3fc   :  { %v3451_v11 = vpack.c.bf16 %v2157_v39, %v2156_v41 }
 0x3fe   :  { %2358 = vmatmul.mubr.f32.gmra.mrb[96].mxu0 %v2180_v60  ;;  %3452 = vmatprep.subr.bf16.mxu0 %v3451_v11 }
 0x3ff   :  { %3454 = vmatpush3.bf16.msra.mxu0 %v3451_v11  ;;  %3304 = vmatprep.mubr.msk.f32.mxu0 %vm956_vm7, %v2161_v27 }
 0x400   :  { %3302 = vmatprep.subr.msk.mxu0 %vm200_vm0, %v2158_v14 }
 0x403   :  { %3303 = vmatpush3.msk.msra.mxu0 %vm200_vm0, %v2158_v14 }
 0x404   :  { %3305 = vmatmul.mubr.msk.f32.vlgmr.msra.gmra.mrb[98].mxu0 %vm956_vm7, %v2164_v44 }
 0x405   :  { %3307 = vmatprep.mubr.msk.f32.mxu0 %vm956_vm7, %v2167_v22 }
 0x408   :  { %3308 = vmatmul.mubr.msk.f32.gmra.mrb[100].mxu0 %vm956_vm7, %v2170_v7 }
 0x409   :  { %3310 = vmatprep.mubr.msk.f32.mxu0 %vm956_vm7, %v2173_v8 }
 0x40c   :  { %3311 = vmatmul.mubr.msk.f32.gmra.mrb[102].mxu0 %vm956_vm7, %v2176_v24 }
 0x40d   :  { %3313 = vmatprep.mubr.msk.f32.mxu0 %vm956_vm7, %v2179_v58 }
 0x410   :  { %3314 = vmatmul.mubr.msk.f32.gmra.mrb[104].mxu0 %vm956_vm7, %v2182_v35  ;;  %v2488_v35 = vpop.permute.xlu1 %2487 }
 0x411   :  { %3332 = vmatprep.mubr.msk.f32.mxu0 %vm1216_vm8, %v2476_v50  ;;  %v2483_v50 = vpop.permute.xlu0 %2482 }
 0x4b5   :  { %v2932_v1 = vpop.f32.mrb[82].mxu0 }
 0x4b6   :  { %v2933_v18 = vpop.f32.mrb[83].mxu0 }
 0x4b7   :  { %v2934_v0 = vadd.f32 %v2933_v18, %v2932_v1 }
 0x4b9   :  { %v2935_v13 = vpop.f32.mrb[84].mxu0  ;;  %v2325_v48 = vadd.f32 %v2934_v0, %v4385_v2 }
 0x4ba   :  { %v2936_v17 = vpop.f32.mrb[85].mxu0 }
 0x4bb   :  { %v2937_v49 = vadd.f32 %v2936_v17, %v2935_v13 }
 0x4bd   :  { %v2938_v12 = vpop.f32.mrb[86].mxu0  ;;  %v2330_v30 = vadd.f32 %v2937_v49, %v4383_v55 }
 0x4be   :  { %v2939_v3 = vpop.f32.mrb[87].mxu0 }
 0x4bf   :  { %v2940_v15 = vadd.f32 %v2939_v3, %v2938_v12 }
 0x4c1   :  { %v2941_v23 = vpop.f32.mrb[88].mxu0  ;;  %v2335_v4 = vadd.f32 %v2940_v15, %v4389_v62 }
 0x4c2   :  { %v2942_v36 = vpop.f32.mrb[89].mxu0 }
 0x4c3   :  { %v2943_v16 = vadd.f32 %v2942_v36, %v2941_v23 }
 0x4c5   :  { %v2944_v19 = vpop.f32.mrb[90].mxu0  ;;  %v2340_v43 = vadd.f32 %v2943_v16, %v4387_v9 }
 0x4c6   :  { %v2945_v21 = vpop.f32.mrb[91].mxu0 }
 0x4c7   :  { %v2946_v57 = vadd.f32 %v2945_v21, %v2944_v19 }
 0x4c9   :  { %v2947_v20 = vpop.f32.mrb[92].mxu0  ;;  %v2345_v2 = vadd.f32 %v2946_v57, %v4393_v52 }
 0x4ca   :  { %v2948_v25 = vpop.f32.mrb[93].mxu0 }
 0x4cb   :  { %v2949_v10 = vadd.f32 %v2948_v25, %v2947_v20 }
 0x4cd   :  { %v2950_v31 = vpop.f32.mrb[94].mxu0  ;;  %v2350_v55 = vadd.f32 %v2949_v10, %v4391_v54 }
 0x4ce   :  { %v2951_v38 = vpop.f32.mrb[95].mxu0 }
 0x4cf   :  { %v2952_v40 = vadd.f32 %v2951_v38, %v2950_v31 }
 0x4d1   :  { %v2953_v59 = vpop.f32.mrb[96].mxu0  ;;  %v2355_v44 = vadd.f32 %v2952_v40, %v4397_v5 }
 0x4d2   :  { %v2954_v51 = vpop.f32.mrb[97].mxu0 }
 0x4d3   :  { %v2955_v33 = vadd.f32 %v2954_v51, %v2953_v59 }
 0x4d5   :  { %v2360_v62 = vadd.f32 %v2955_v33, %v4395_v63  ;;  %v2477_v63 = vld [vmem:[%s4717_s5 + $0x8] sm:$0x3] }
 0x4d7   :  { %v3306_v37 = vpop.f32.mrb[98].mxu0 }
 0x4d8   :  { %v2435_v28 = vadd.f32 %v3306_v37, %v2330_v30  ;;  %v2429_v61 = vpop.f32.mrb[99].mxu0 }
 0x4d9   :  { %v2430_v56 = vadd.f32 %v2429_v61, %v2325_v48 }
 0x4da   :  { %v2469_v6 = vmax.f32 %v2435_v28, 0.0 }
 0x4db   :  { %v2468_v42 = vmax.f32 %v2430_v56, 0.0  ;;  %v3309_v32 = vpop.f32.mrb[100].mxu0 }
 0x4dc   :  { %v2445_v34 = vadd.f32 %v3309_v32, %v2340_v43  ;;  %v2439_v41 = vpop.f32.mrb[101].mxu0 }
 0x4dd   :  { %v3455_v29 = vpack.c.bf16 %v2469_v6, %v2468_v42  ;;  %v2440_v46 = vadd.f32 %v2439_v41, %v2335_v4 }
 0x4de   :  { %v2471_v47 = vmax.f32 %v2445_v34, 0.0 }
 0x4df   :  { %v2470_v53 = vmax.f32 %v2440_v46, 0.0  ;;  %v3312_v26 = vpop.f32.mrb[102].mxu0  ;;  %3456 = vmatprep.subr.bf16.mxu0 %v3455_v29 }
 0x4e0   :  { %v2455_v45 = vadd.f32 %v3312_v26, %v2350_v55  ;;  %v2449_v39 = vpop.f32.mrb[103].mxu0  ;;  %3458 = vmatpush3.bf16.msra.mxu0 %v3455_v29 }
 0x4e1   :  { %v3459_v9 = vpack.c.bf16 %v2471_v47, %v2470_v53  ;;  %v2450_v60 = vadd.f32 %v2449_v39, %v2345_v2 }
 0x4e2   :  { %v2473_v11 = vmax.f32 %v2455_v45, 0.0 }
 0x4e3   :  { %v2472_v27 = vmax.f32 %v2450_v60, 0.0  ;;  %v3315_v14 = vpop.f32.mrb[104].mxu0  ;;  %3460 = vmatprep.subr.bf16.mxu0 %v3459_v9 }
 0x4e4   :  { %v2465_v22 = vadd.f32 %v3315_v14, %v2360_v62  ;;  %v2459_v54 = vpop.f32.mrb[105].mxu0  ;;  %3462 = vmatpush3.bf16.msra.mxu0 %v3459_v9 }
 0x4e5   :  { %v3463_v7 = vpack.c.bf16 %v2473_v11, %v2472_v27  ;;  %v2460_v8 = vadd.f32 %v2459_v54, %v2355_v44 }
 0x4e6   :  { %v2475_v24 = vmax.f32 %v2465_v22, 0.0 }
 0x4e7   :  { %v2474_v52 = vmax.f32 %v2460_v8, 0.0  ;;  %3464 = vmatprep.subr.bf16.mxu0 %v3463_v7 }
 0x4e8   :  { %3466 = vmatpush3.bf16.msra.mxu0 %v3463_v7 }
 0x4e9   :  { %v3467_v58 = vpack.c.bf16 %v2475_v24, %v2474_v52 }
 0x4eb   :  { %3468 = vmatprep.subr.bf16.mxu0 %v3467_v58 }
 0x4ec   :  { %3470 = vmatpush3.bf16.msra.mxu0 %v3467_v58 }
 0x4ef   :  { %3333 = vmatmul.mubr.msk.f32.vlgmr.msra.gmra.mrb[106].mxu0 %vm1216_vm8, %v2477_v63 }
 0x5c2   :  { %v3334_v5 = vpop.f32.mrb[106].mxu0 }
 0x5c3   :  { %v2568_v1 = vadd.f32 %v3334_v5, %v2488_v35  ;;  %v2562_v18 = vpop.f32.mrb[107].mxu0 }
 0x5c4   :  { %v2563_v0 = vadd.f32 %v2562_v18, %v2483_v50 }
 0x5c5   :  { %v2572_v13 = vmax.f32 %v2568_v1, 0.0 }
 0x5c6   :  { %v2571_v17 = vmax.f32 %v2563_v0, 0.0 }
 0x5c7   :  { %2730 = vst.msk [vmem:[%s4718_s7 + $0x18] sm:$0x3] %vm1302_vm9, %v2572_v13 }
 0x5c8   :  { %2729 = vst.msk [vmem:[%s4718_s7 + $0x10] sm:$0xff] %vm1300_vm10, %v2571_v17 }

</bundles_post_ra>
